<compile_context>
chip_gen: v5e
topology: v5e:2x2
jax: 0.10.0
libtpu: 0.0.40
codegen_flags: <defaults>
</compile_context>

<pallas_src>
import math
import jax
import jax.numpy as jnp
from jax import lax
from jax.experimental import pallas as pl
from jax.experimental.pallas import tpu as pltpu

VOCAB = 100   # input_size
EMB = 128     # embedding dim
HID = 64      # LSTM hidden size
OUT = 10      # output_size
LANE = 128


def _rup(n, m):
    return ((n + m - 1) // m) * m


def nlp_kernel(ids_ref, emb_ref, wih_ref, whh_ref, b_ref, wfc_ref, bfc_ref, out_ref):
    # ids_ref: VMEM (T*B, 1) int32, time-major (row t*B + b == x[b, t])
    # emb_ref: VMEM (Vp, EMB)
    # wih_ref: VMEM (EMB, 4*Hp); whh_ref: VMEM (Hp, 4*Hp); b_ref: VMEM (1, 4*Hp)
    # wfc_ref: VMEM (Hp, OUTp);  bfc_ref: VMEM (1, OUTp);  out_ref: VMEM (B, OUTp)
    TB = ids_ref.shape[0]
    Vp = emb_ref.shape[0]
    Hp = whh_ref.shape[0]
    B = out_ref.shape[0]
    T = TB // B

    # ---- Hoisted out of the recurrence: one one-hot build, one embedding
    # matmul and one input-projection matmul over all B*T tokens (bias folded
    # in). The serial loop below only carries the tiny h @ W_hh dependency. ----
    # TODO(synk): ids >= VOCAB silently select a zero embedding row here,
    # whereas PyTorch's nn.Embedding would raise an index error.
    ids = ids_ref[...]                                                         # (TB, 1)
    onehot = (lax.broadcasted_iota(jnp.int32, (TB, Vp), 1) == ids).astype(jnp.float32)
    x_all = jnp.dot(onehot, emb_ref[...], preferred_element_type=jnp.float32)  # (TB, EMB)
    xproj = (jnp.dot(x_all, wih_ref[...], preferred_element_type=jnp.float32)
             + b_ref[...])                                                     # (TB, 4*Hp)

    whh = whh_ref[...]
    h = jnp.zeros((B, Hp), jnp.float32)
    c = jnp.zeros((B, Hp), jnp.float32)
    # T is small and static: fully unroll so the scheduler can overlap the MXU
    # drain, EUP (sigmoid/tanh) and VPU work across adjacent steps.
    # Elementwise gate math stays in float32 (safe on v5e/v6e/v7x).
    for t in range(T):
        g = (xproj[t * B:(t + 1) * B, :]
             + jnp.dot(h, whh, preferred_element_type=jnp.float32))            # (B, 4*Hp)
        # Hp == 128, so each gate slice is a full 128-lane block (free vreg picks).
        i = jax.nn.sigmoid(g[:, 0:Hp])
        f = jax.nn.sigmoid(g[:, Hp:2 * Hp])
        gg = jnp.tanh(g[:, 2 * Hp:3 * Hp])
        o = jax.nn.sigmoid(g[:, 3 * Hp:4 * Hp])
        c = f * c + i * gg
        h = o * jnp.tanh(c)

    # fc on the last timestep's hidden state (lstm_out[:, -1, :]); lane-dense store.
    out_ref[...] = (jnp.dot(h, wfc_ref[...], preferred_element_type=jnp.float32)
                    + bfc_ref[...])


def your_nlp_model(x, emb, wih_t, whh_t, bias, wfc_t, bfc):
    B, T = x.shape
    V, E = emb.shape
    H = whh_t.shape[0]
    O = wfc_t.shape[1]
    Vp, Hp, Op = _rup(V, LANE), _rup(H, LANE), _rup(O, LANE)

    # Zero-pad to lane-aligned shapes. Padded gate columns / hidden rows / bias
    # entries are zero, so the padded h/c lanes stay exactly 0 every step and
    # never contaminate the real lanes.
    emb_p = jnp.zeros((Vp, E), jnp.float32).at[:V, :].set(emb)
    wih_p = (jnp.zeros((E, 4, Hp), jnp.float32)
             .at[:, :, :H].set(wih_t.reshape(E, 4, H)).reshape(E, 4 * Hp))
    whh_p = (jnp.zeros((Hp, 4, Hp), jnp.float32)
             .at[:H, :, :H].set(whh_t.reshape(H, 4, H)).reshape(Hp, 4 * Hp))
    b_p = (jnp.zeros((1, 4, Hp), jnp.float32)
           .at[:, :, :H].set(bias.reshape(1, 4, H)).reshape(1, 4 * Hp))
    wfc_p = jnp.zeros((Hp, Op), jnp.float32).at[:H, :O].set(wfc_t)
    bfc_p = jnp.zeros((1, Op), jnp.float32).at[:, :O].set(bfc)

    # Time-major token ids so each timestep's rows are a contiguous static slice.
    ids_tm = x.T.reshape(T * B, 1).astype(jnp.int32)

    flops = 2 * T * B * (Vp * E + E * 4 * Hp + Hp * 4 * Hp) + 2 * B * Hp * Op
    trans = 5 * T * B * Hp
    nbytes = int(sum(int(a.size) * a.dtype.itemsize
                     for a in (ids_tm, emb_p, wih_p, whh_p, b_p, wfc_p, bfc_p))
                 + B * Op * 4)

    out_p = pl.pallas_call(
        nlp_kernel,
        out_shape=jax.ShapeDtypeStruct((B, Op), jnp.float32),
        in_specs=[
            pl.BlockSpec(memory_space=pltpu.MemorySpace.VMEM),   # token ids (time-major)
            pl.BlockSpec(memory_space=pltpu.MemorySpace.VMEM),   # embedding table (padded)
            pl.BlockSpec(memory_space=pltpu.MemorySpace.VMEM),   # W_ih^T (padded)
            pl.BlockSpec(memory_space=pltpu.MemorySpace.VMEM),   # W_hh^T (padded)
            pl.BlockSpec(memory_space=pltpu.MemorySpace.VMEM),   # b_ih + b_hh (padded)
            pl.BlockSpec(memory_space=pltpu.MemorySpace.VMEM),   # W_fc^T (padded)
            pl.BlockSpec(memory_space=pltpu.MemorySpace.VMEM),   # b_fc (padded)
        ],
        out_specs=pl.BlockSpec(memory_space=pltpu.MemorySpace.VMEM),
        cost_estimate=pl.CostEstimate(flops=flops, transcendentals=trans,
                                      bytes_accessed=nbytes),
    )(ids_tm, emb_p, wih_p, whh_p, b_p, wfc_p, bfc_p)
    return out_p[:, :O]


def reference(x, emb, wih_t, whh_t, bias, wfc_t, bfc):
    # pure-JAX reference of the PyTorch forward (embedding -> LSTM -> fc(last))
    e = jnp.take(emb, x, axis=0)
    B, T, _ = e.shape
    h = jnp.zeros((B, HID), jnp.float32)
    c = jnp.zeros((B, HID), jnp.float32)
    for t in range(T):
        g = e[:, t, :] @ wih_t + h @ whh_t + bias
        i = jax.nn.sigmoid(g[:, :HID])
        f = jax.nn.sigmoid(g[:, HID:2 * HID])
        gg = jnp.tanh(g[:, 2 * HID:3 * HID])
        o = jax.nn.sigmoid(g[:, 3 * HID:])
        c = f * c + i * gg
        h = o * jnp.tanh(c)
    return h @ wfc_t + bfc


def init_params(key):
    ks = jax.random.split(key, 7)
    emb = jax.random.normal(ks[0], (VOCAB, EMB), jnp.float32)          # nn.Embedding ~ N(0,1)
    stdv = 1.0 / math.sqrt(HID)                                        # nn.LSTM uniform init
    w_ih = jax.random.uniform(ks[1], (4 * HID, EMB), jnp.float32, -stdv, stdv)
    w_hh = jax.random.uniform(ks[2], (4 * HID, HID), jnp.float32, -stdv, stdv)
    b_ih = jax.random.uniform(ks[3], (4 * HID,), jnp.float32, -stdv, stdv)
    b_hh = jax.random.uniform(ks[4], (4 * HID,), jnp.float32, -stdv, stdv)
    stdf = 1.0 / math.sqrt(HID)                                        # nn.Linear uniform init
    w_fc = jax.random.uniform(ks[5], (OUT, HID), jnp.float32, -stdf, stdf)
    b_fc = jax.random.uniform(ks[6], (OUT,), jnp.float32, -stdf, stdf)
    return (emb, w_ih.T, w_hh.T, (b_ih + b_hh)[None, :], w_fc.T, b_fc[None, :])


if __name__ == "__main__":
    B, T = 2, 8
    key = jax.random.PRNGKey(0)
    kx, kp = jax.random.split(key)
    x = jax.random.randint(kx, (B, T), 0, VOCAB, dtype=jnp.int32)
    params = init_params(kp)

    out = your_nlp_model(x, *params)
    out = jax.block_until_ready(out)

    ref = jax.block_until_ready(reference(x, *params))
    assert out.shape == (B, OUT)
    assert jnp.allclose(out, ref, rtol=1e-3, atol=1e-3), (out, ref)
    print("KERNEL_OK")
</pallas_src>

<mosaic_0001>
module attributes {stable_mosaic.version = 11 : i64} {
  func.func @nlp_kernel(%arg0: memref<16x1xi32, #tpu.memory_space<vmem>>, %arg1: memref<128x128xf32, #tpu.memory_space<vmem>>, %arg2: memref<128x512xf32, #tpu.memory_space<vmem>>, %arg3: memref<128x512xf32, #tpu.memory_space<vmem>>, %arg4: memref<1x512xf32, #tpu.memory_space<vmem>>, %arg5: memref<128x128xf32, #tpu.memory_space<vmem>>, %arg6: memref<1x128xf32, #tpu.memory_space<vmem>>, %arg7: memref<2x128xf32, #tpu.memory_space<vmem>>) attributes {dimension_semantics = [], scalar_prefetch = 0 : i64, scratch_operands = 0 : i64, tpu.core_type = #tpu.core_type<tc>} {
    %c0 = arith.constant 0 : index
    %c0_0 = arith.constant 0 : index
    %0 = vector.load %arg0[%c0, %c0_0] : memref<16x1xi32, #tpu.memory_space<vmem>>, vector<16x1xi32>
    %1 = tpu.iota {dimensions = array<i32: 1>} : vector<16x128xi32>
    %2 = vector.broadcast %0 : vector<16x1xi32> to vector<16x128xi32>
    %3 = arith.cmpi eq, %1, %2 : vector<16x128xi32>
    %4 = arith.extui %3 : vector<16x128xi1> to vector<16x128xi32>
    %5 = arith.sitofp %4 : vector<16x128xi32> to vector<16x128xf32>
    %c0_1 = arith.constant 0 : index
    %c0_2 = arith.constant 0 : index
    %6 = vector.load %arg1[%c0_1, %c0_2] : memref<128x128xf32, #tpu.memory_space<vmem>>, vector<128x128xf32>
    %cst = arith.constant dense<0.000000e+00> : vector<16x128xf32>
    %7 = tpu.matmul %5, %6, %cst {dimension_numbers = #tpu.dot_dimension_numbers<[1], [0], [0], [1], [0, 0, 1, 1], [], []>} : vector<16x128xf32>, vector<128x128xf32>, vector<16x128xf32> -> vector<16x128xf32>
    %c0_3 = arith.constant 0 : index
    %c0_4 = arith.constant 0 : index
    %8 = vector.load %arg2[%c0_3, %c0_4] : memref<128x512xf32, #tpu.memory_space<vmem>>, vector<128x512xf32>
    %cst_5 = arith.constant dense<0.000000e+00> : vector<16x512xf32>
    %9 = tpu.matmul %7, %8, %cst_5 {dimension_numbers = #tpu.dot_dimension_numbers<[1], [0], [0], [1], [0, 0, 1, 1], [], []>} : vector<16x128xf32>, vector<128x512xf32>, vector<16x512xf32> -> vector<16x512xf32>
    %c0_6 = arith.constant 0 : index
    %c0_7 = arith.constant 0 : index
    %10 = vector.load %arg4[%c0_6, %c0_7] : memref<1x512xf32, #tpu.memory_space<vmem>>, vector<1x512xf32>
    %11 = vector.broadcast %10 : vector<1x512xf32> to vector<16x512xf32>
    %12 = arith.addf %9, %11 : vector<16x512xf32>
    %c0_8 = arith.constant 0 : index
    %c0_9 = arith.constant 0 : index
    %13 = vector.load %arg3[%c0_8, %c0_9] : memref<128x512xf32, #tpu.memory_space<vmem>>, vector<128x512xf32>
    %cst_10 = arith.constant 0.000000e+00 : f32
    %14 = vector.broadcast %cst_10 : f32 to vector<2x128xf32>
    %cst_11 = arith.constant 0.000000e+00 : f32
    %15 = vector.broadcast %cst_11 : f32 to vector<2x128xf32>
    %16 = vector.extract_strided_slice %12 {offsets = [0, 0], sizes = [2, 512], strides = [1, 1]} : vector<16x512xf32> to vector<2x512xf32>
    %cst_12 = arith.constant dense<0.000000e+00> : vector<2x512xf32>
    %17 = tpu.matmul %14, %13, %cst_12 {dimension_numbers = #tpu.dot_dimension_numbers<[1], [0], [0], [1], [0, 0, 1, 1], [], []>} : vector<2x128xf32>, vector<128x512xf32>, vector<2x512xf32> -> vector<2x512xf32>
    %18 = arith.addf %16, %17 : vector<2x512xf32>
    %19 = vector.extract_strided_slice %18 {offsets = [0, 0], sizes = [2, 128], strides = [1, 1]} : vector<2x512xf32> to vector<2x128xf32>
    %20 = arith.negf %19 : vector<2x128xf32>
    %21 = math.exp %20 : vector<2x128xf32>
    %cst_13 = arith.constant 1.000000e+00 : f32
    %22 = vector.broadcast %cst_13 : f32 to vector<2x128xf32>
    %23 = arith.addf %22, %21 : vector<2x128xf32>
    %24 = arith.divf %22, %23 : vector<2x128xf32>
    %25 = vector.extract_strided_slice %18 {offsets = [0, 128], sizes = [2, 128], strides = [1, 1]} : vector<2x512xf32> to vector<2x128xf32>
    %26 = arith.negf %25 : vector<2x128xf32>
    %27 = math.exp %26 : vector<2x128xf32>
    %cst_14 = arith.constant 1.000000e+00 : f32
    %28 = vector.broadcast %cst_14 : f32 to vector<2x128xf32>
    %29 = arith.addf %28, %27 : vector<2x128xf32>
    %30 = arith.divf %28, %29 : vector<2x128xf32>
    %31 = vector.extract_strided_slice %18 {offsets = [0, 256], sizes = [2, 128], strides = [1, 1]} : vector<2x512xf32> to vector<2x128xf32>
    %32 = math.tanh %31 : vector<2x128xf32>
    %33 = vector.extract_strided_slice %18 {offsets = [0, 384], sizes = [2, 128], strides = [1, 1]} : vector<2x512xf32> to vector<2x128xf32>
    %34 = arith.negf %33 : vector<2x128xf32>
    %35 = math.exp %34 : vector<2x128xf32>
    %cst_15 = arith.constant 1.000000e+00 : f32
    %36 = vector.broadcast %cst_15 : f32 to vector<2x128xf32>
    %37 = arith.addf %36, %35 : vector<2x128xf32>
    %38 = arith.divf %36, %37 : vector<2x128xf32>
    %39 = arith.mulf %30, %15 : vector<2x128xf32>
    %40 = arith.mulf %24, %32 : vector<2x128xf32>
    %41 = arith.addf %39, %40 : vector<2x128xf32>
    %42 = math.tanh %41 : vector<2x128xf32>
    %43 = arith.mulf %38, %42 : vector<2x128xf32>
    %44 = vector.extract_strided_slice %12 {offsets = [2, 0], sizes = [2, 512], strides = [1, 1]} : vector<16x512xf32> to vector<2x512xf32>
    %cst_16 = arith.constant dense<0.000000e+00> : vector<2x512xf32>
    %45 = tpu.matmul %43, %13, %cst_16 {dimension_numbers = #tpu.dot_dimension_numbers<[1], [0], [0], [1], [0, 0, 1, 1], [], []>} : vector<2x128xf32>, vector<128x512xf32>, vector<2x512xf32> -> vector<2x512xf32>
    %46 = arith.addf %44, %45 : vector<2x512xf32>
    %47 = vector.extract_strided_slice %46 {offsets = [0, 0], sizes = [2, 128], strides = [1, 1]} : vector<2x512xf32> to vector<2x128xf32>
    %48 = arith.negf %47 : vector<2x128xf32>
    %49 = math.exp %48 : vector<2x128xf32>
    %cst_17 = arith.constant 1.000000e+00 : f32
    %50 = vector.broadcast %cst_17 : f32 to vector<2x128xf32>
    %51 = arith.addf %50, %49 : vector<2x128xf32>
    %52 = arith.divf %50, %51 : vector<2x128xf32>
    %53 = vector.extract_strided_slice %46 {offsets = [0, 128], sizes = [2, 128], strides = [1, 1]} : vector<2x512xf32> to vector<2x128xf32>
    %54 = arith.negf %53 : vector<2x128xf32>
    %55 = math.exp %54 : vector<2x128xf32>
    %cst_18 = arith.constant 1.000000e+00 : f32
    %56 = vector.broadcast %cst_18 : f32 to vector<2x128xf32>
    %57 = arith.addf %56, %55 : vector<2x128xf32>
    %58 = arith.divf %56, %57 : vector<2x128xf32>
    %59 = vector.extract_strided_slice %46 {offsets = [0, 256], sizes = [2, 128], strides = [1, 1]} : vector<2x512xf32> to vector<2x128xf32>
    %60 = math.tanh %59 : vector<2x128xf32>
    %61 = vector.extract_strided_slice %46 {offsets = [0, 384], sizes = [2, 128], strides = [1, 1]} : vector<2x512xf32> to vector<2x128xf32>
    %62 = arith.negf %61 : vector<2x128xf32>
    %63 = math.exp %62 : vector<2x128xf32>
    %cst_19 = arith.constant 1.000000e+00 : f32
    %64 = vector.broadcast %cst_19 : f32 to vector<2x128xf32>
    %65 = arith.addf %64, %63 : vector<2x128xf32>
    %66 = arith.divf %64, %65 : vector<2x128xf32>
    %67 = arith.mulf %58, %41 : vector<2x128xf32>
    %68 = arith.mulf %52, %60 : vector<2x128xf32>
    %69 = arith.addf %67, %68 : vector<2x128xf32>
    %70 = math.tanh %69 : vector<2x128xf32>
    %71 = arith.mulf %66, %70 : vector<2x128xf32>
    %72 = vector.extract_strided_slice %12 {offsets = [4, 0], sizes = [2, 512], strides = [1, 1]} : vector<16x512xf32> to vector<2x512xf32>
    %cst_20 = arith.constant dense<0.000000e+00> : vector<2x512xf32>
    %73 = tpu.matmul %71, %13, %cst_20 {dimension_numbers = #tpu.dot_dimension_numbers<[1], [0], [0], [1], [0, 0, 1, 1], [], []>} : vector<2x128xf32>, vector<128x512xf32>, vector<2x512xf32> -> vector<2x512xf32>
    %74 = arith.addf %72, %73 : vector<2x512xf32>
    %75 = vector.extract_strided_slice %74 {offsets = [0, 0], sizes = [2, 128], strides = [1, 1]} : vector<2x512xf32> to vector<2x128xf32>
    %76 = arith.negf %75 : vector<2x128xf32>
    %77 = math.exp %76 : vector<2x128xf32>
    %cst_21 = arith.constant 1.000000e+00 : f32
    %78 = vector.broadcast %cst_21 : f32 to vector<2x128xf32>
    %79 = arith.addf %78, %77 : vector<2x128xf32>
    %80 = arith.divf %78, %79 : vector<2x128xf32>
    %81 = vector.extract_strided_slice %74 {offsets = [0, 128], sizes = [2, 128], strides = [1, 1]} : vector<2x512xf32> to vector<2x128xf32>
    %82 = arith.negf %81 : vector<2x128xf32>
    %83 = math.exp %82 : vector<2x128xf32>
    %cst_22 = arith.constant 1.000000e+00 : f32
    %84 = vector.broadcast %cst_22 : f32 to vector<2x128xf32>
    %85 = arith.addf %84, %83 : vector<2x128xf32>
    %86 = arith.divf %84, %85 : vector<2x128xf32>
    %87 = vector.extract_strided_slice %74 {offsets = [0, 256], sizes = [2, 128], strides = [1, 1]} : vector<2x512xf32> to vector<2x128xf32>
    %88 = math.tanh %87 : vector<2x128xf32>
    %89 = vector.extract_strided_slice %74 {offsets = [0, 384], sizes = [2, 128], strides = [1, 1]} : vector<2x512xf32> to vector<2x128xf32>
    %90 = arith.negf %89 : vector<2x128xf32>
    %91 = math.exp %90 : vector<2x128xf32>
    %cst_23 = arith.constant 1.000000e+00 : f32
    %92 = vector.broadcast %cst_23 : f32 to vector<2x128xf32>
    %93 = arith.addf %92, %91 : vector<2x128xf32>
    %94 = arith.divf %92, %93 : vector<2x128xf32>
    %95 = arith.mulf %86, %69 : vector<2x128xf32>
    %96 = arith.mulf %80, %88 : vector<2x128xf32>
    %97 = arith.addf %95, %96 : vector<2x128xf32>
    %98 = math.tanh %97 : vector<2x128xf32>
    %99 = arith.mulf %94, %98 : vector<2x128xf32>
    %100 = vector.extract_strided_slice %12 {offsets = [6, 0], sizes = [2, 512], strides = [1, 1]} : vector<16x512xf32> to vector<2x512xf32>
    %cst_24 = arith.constant dense<0.000000e+00> : vector<2x512xf32>
    %101 = tpu.matmul %99, %13, %cst_24 {dimension_numbers = #tpu.dot_dimension_numbers<[1], [0], [0], [1], [0, 0, 1, 1], [], []>} : vector<2x128xf32>, vector<128x512xf32>, vector<2x512xf32> -> vector<2x512xf32>
    %102 = arith.addf %100, %101 : vector<2x512xf32>
    %103 = vector.extract_strided_slice %102 {offsets = [0, 0], sizes = [2, 128], strides = [1, 1]} : vector<2x512xf32> to vector<2x128xf32>
    %104 = arith.negf %103 : vector<2x128xf32>
    %105 = math.exp %104 : vector<2x128xf32>
    %cst_25 = arith.constant 1.000000e+00 : f32
    %106 = vector.broadcast %cst_25 : f32 to vector<2x128xf32>
    %107 = arith.addf %106, %105 : vector<2x128xf32>
    %108 = arith.divf %106, %107 : vector<2x128xf32>
    %109 = vector.extract_strided_slice %102 {offsets = [0, 128], sizes = [2, 128], strides = [1, 1]} : vector<2x512xf32> to vector<2x128xf32>
    %110 = arith.negf %109 : vector<2x128xf32>
    %111 = math.exp %110 : vector<2x128xf32>
    %cst_26 = arith.constant 1.000000e+00 : f32
    %112 = vector.broadcast %cst_26 : f32 to vector<2x128xf32>
    %113 = arith.addf %112, %111 : vector<2x128xf32>
    %114 = arith.divf %112, %113 : vector<2x128xf32>
    %115 = vector.extract_strided_slice %102 {offsets = [0, 256], sizes = [2, 128], strides = [1, 1]} : vector<2x512xf32> to vector<2x128xf32>
    %116 = math.tanh %115 : vector<2x128xf32>
    %117 = vector.extract_strided_slice %102 {offsets = [0, 384], sizes = [2, 128], strides = [1, 1]} : vector<2x512xf32> to vector<2x128xf32>
    %118 = arith.negf %117 : vector<2x128xf32>
    %119 = math.exp %118 : vector<2x128xf32>
    %cst_27 = arith.constant 1.000000e+00 : f32
    %120 = vector.broadcast %cst_27 : f32 to vector<2x128xf32>
    %121 = arith.addf %120, %119 : vector<2x128xf32>
    %122 = arith.divf %120, %121 : vector<2x128xf32>
    %123 = arith.mulf %114, %97 : vector<2x128xf32>
    %124 = arith.mulf %108, %116 : vector<2x128xf32>
    %125 = arith.addf %123, %124 : vector<2x128xf32>
    %126 = math.tanh %125 : vector<2x128xf32>
    %127 = arith.mulf %122, %126 : vector<2x128xf32>
    %128 = vector.extract_strided_slice %12 {offsets = [8, 0], sizes = [2, 512], strides = [1, 1]} : vector<16x512xf32> to vector<2x512xf32>
    %cst_28 = arith.constant dense<0.000000e+00> : vector<2x512xf32>
    %129 = tpu.matmul %127, %13, %cst_28 {dimension_numbers = #tpu.dot_dimension_numbers<[1], [0], [0], [1], [0, 0, 1, 1], [], []>} : vector<2x128xf32>, vector<128x512xf32>, vector<2x512xf32> -> vector<2x512xf32>
    %130 = arith.addf %128, %129 : vector<2x512xf32>
    %131 = vector.extract_strided_slice %130 {offsets = [0, 0], sizes = [2, 128], strides = [1, 1]} : vector<2x512xf32> to vector<2x128xf32>
    %132 = arith.negf %131 : vector<2x128xf32>
    %133 = math.exp %132 : vector<2x128xf32>
    %cst_29 = arith.constant 1.000000e+00 : f32
    %134 = vector.broadcast %cst_29 : f32 to vector<2x128xf32>
    %135 = arith.addf %134, %133 : vector<2x128xf32>
    %136 = arith.divf %134, %135 : vector<2x128xf32>
    %137 = vector.extract_strided_slice %130 {offsets = [0, 128], sizes = [2, 128], strides = [1, 1]} : vector<2x512xf32> to vector<2x128xf32>
    %138 = arith.negf %137 : vector<2x128xf32>
    %139 = math.exp %138 : vector<2x128xf32>
    %cst_30 = arith.constant 1.000000e+00 : f32
    %140 = vector.broadcast %cst_30 : f32 to vector<2x128xf32>
    %141 = arith.addf %140, %139 : vector<2x128xf32>
    %142 = arith.divf %140, %141 : vector<2x128xf32>
    %143 = vector.extract_strided_slice %130 {offsets = [0, 256], sizes = [2, 128], strides = [1, 1]} : vector<2x512xf32> to vector<2x128xf32>
    %144 = math.tanh %143 : vector<2x128xf32>
    %145 = vector.extract_strided_slice %130 {offsets = [0, 384], sizes = [2, 128], strides = [1, 1]} : vector<2x512xf32> to vector<2x128xf32>
    %146 = arith.negf %145 : vector<2x128xf32>
    %147 = math.exp %146 : vector<2x128xf32>
    %cst_31 = arith.constant 1.000000e+00 : f32
    %148 = vector.broadcast %cst_31 : f32 to vector<2x128xf32>
    %149 = arith.addf %148, %147 : vector<2x128xf32>
    %150 = arith.divf %148, %149 : vector<2x128xf32>
    %151 = arith.mulf %142, %125 : vector<2x128xf32>
    %152 = arith.mulf %136, %144 : vector<2x128xf32>
    %153 = arith.addf %151, %152 : vector<2x128xf32>
    %154 = math.tanh %153 : vector<2x128xf32>
    %155 = arith.mulf %150, %154 : vector<2x128xf32>
    %156 = vector.extract_strided_slice %12 {offsets = [10, 0], sizes = [2, 512], strides = [1, 1]} : vector<16x512xf32> to vector<2x512xf32>
    %cst_32 = arith.constant dense<0.000000e+00> : vector<2x512xf32>
    %157 = tpu.matmul %155, %13, %cst_32 {dimension_numbers = #tpu.dot_dimension_numbers<[1], [0], [0], [1], [0, 0, 1, 1], [], []>} : vector<2x128xf32>, vector<128x512xf32>, vector<2x512xf32> -> vector<2x512xf32>
    %158 = arith.addf %156, %157 : vector<2x512xf32>
    %159 = vector.extract_strided_slice %158 {offsets = [0, 0], sizes = [2, 128], strides = [1, 1]} : vector<2x512xf32> to vector<2x128xf32>
    %160 = arith.negf %159 : vector<2x128xf32>
    %161 = math.exp %160 : vector<2x128xf32>
    %cst_33 = arith.constant 1.000000e+00 : f32
    %162 = vector.broadcast %cst_33 : f32 to vector<2x128xf32>
    %163 = arith.addf %162, %161 : vector<2x128xf32>
    %164 = arith.divf %162, %163 : vector<2x128xf32>
    %165 = vector.extract_strided_slice %158 {offsets = [0, 128], sizes = [2, 128], strides = [1, 1]} : vector<2x512xf32> to vector<2x128xf32>
    %166 = arith.negf %165 : vector<2x128xf32>
    %167 = math.exp %166 : vector<2x128xf32>
    %cst_34 = arith.constant 1.000000e+00 : f32
    %168 = vector.broadcast %cst_34 : f32 to vector<2x128xf32>
    %169 = arith.addf %168, %167 : vector<2x128xf32>
    %170 = arith.divf %168, %169 : vector<2x128xf32>
    %171 = vector.extract_strided_slice %158 {offsets = [0, 256], sizes = [2, 128], strides = [1, 1]} : vector<2x512xf32> to vector<2x128xf32>
    %172 = math.tanh %171 : vector<2x128xf32>
    %173 = vector.extract_strided_slice %158 {offsets = [0, 384], sizes = [2, 128], strides = [1, 1]} : vector<2x512xf32> to vector<2x128xf32>
    %174 = arith.negf %173 : vector<2x128xf32>
    %175 = math.exp %174 : vector<2x128xf32>
    %cst_35 = arith.constant 1.000000e+00 : f32
    %176 = vector.broadcast %cst_35 : f32 to vector<2x128xf32>
    %177 = arith.addf %176, %175 : vector<2x128xf32>
    %178 = arith.divf %176, %177 : vector<2x128xf32>
    %179 = arith.mulf %170, %153 : vector<2x128xf32>
    %180 = arith.mulf %164, %172 : vector<2x128xf32>
    %181 = arith.addf %179, %180 : vector<2x128xf32>
    %182 = math.tanh %181 : vector<2x128xf32>
    %183 = arith.mulf %178, %182 : vector<2x128xf32>
    %184 = vector.extract_strided_slice %12 {offsets = [12, 0], sizes = [2, 512], strides = [1, 1]} : vector<16x512xf32> to vector<2x512xf32>
    %cst_36 = arith.constant dense<0.000000e+00> : vector<2x512xf32>
    %185 = tpu.matmul %183, %13, %cst_36 {dimension_numbers = #tpu.dot_dimension_numbers<[1], [0], [0], [1], [0, 0, 1, 1], [], []>} : vector<2x128xf32>, vector<128x512xf32>, vector<2x512xf32> -> vector<2x512xf32>
    %186 = arith.addf %184, %185 : vector<2x512xf32>
    %187 = vector.extract_strided_slice %186 {offsets = [0, 0], sizes = [2, 128], strides = [1, 1]} : vector<2x512xf32> to vector<2x128xf32>
    %188 = arith.negf %187 : vector<2x128xf32>
    %189 = math.exp %188 : vector<2x128xf32>
    %cst_37 = arith.constant 1.000000e+00 : f32
    %190 = vector.broadcast %cst_37 : f32 to vector<2x128xf32>
    %191 = arith.addf %190, %189 : vector<2x128xf32>
    %192 = arith.divf %190, %191 : vector<2x128xf32>
    %193 = vector.extract_strided_slice %186 {offsets = [0, 128], sizes = [2, 128], strides = [1, 1]} : vector<2x512xf32> to vector<2x128xf32>
    %194 = arith.negf %193 : vector<2x128xf32>
    %195 = math.exp %194 : vector<2x128xf32>
    %cst_38 = arith.constant 1.000000e+00 : f32
    %196 = vector.broadcast %cst_38 : f32 to vector<2x128xf32>
    %197 = arith.addf %196, %195 : vector<2x128xf32>
    %198 = arith.divf %196, %197 : vector<2x128xf32>
    %199 = vector.extract_strided_slice %186 {offsets = [0, 256], sizes = [2, 128], strides = [1, 1]} : vector<2x512xf32> to vector<2x128xf32>
    %200 = math.tanh %199 : vector<2x128xf32>
    %201 = vector.extract_strided_slice %186 {offsets = [0, 384], sizes = [2, 128], strides = [1, 1]} : vector<2x512xf32> to vector<2x128xf32>
    %202 = arith.negf %201 : vector<2x128xf32>
    %203 = math.exp %202 : vector<2x128xf32>
    %cst_39 = arith.constant 1.000000e+00 : f32
    %204 = vector.broadcast %cst_39 : f32 to vector<2x128xf32>
    %205 = arith.addf %204, %203 : vector<2x128xf32>
    %206 = arith.divf %204, %205 : vector<2x128xf32>
    %207 = arith.mulf %198, %181 : vector<2x128xf32>
    %208 = arith.mulf %192, %200 : vector<2x128xf32>
    %209 = arith.addf %207, %208 : vector<2x128xf32>
    %210 = math.tanh %209 : vector<2x128xf32>
    %211 = arith.mulf %206, %210 : vector<2x128xf32>
    %212 = vector.extract_strided_slice %12 {offsets = [14, 0], sizes = [2, 512], strides = [1, 1]} : vector<16x512xf32> to vector<2x512xf32>
    %cst_40 = arith.constant dense<0.000000e+00> : vector<2x512xf32>
    %213 = tpu.matmul %211, %13, %cst_40 {dimension_numbers = #tpu.dot_dimension_numbers<[1], [0], [0], [1], [0, 0, 1, 1], [], []>} : vector<2x128xf32>, vector<128x512xf32>, vector<2x512xf32> -> vector<2x512xf32>
    %214 = arith.addf %212, %213 : vector<2x512xf32>
    %215 = vector.extract_strided_slice %214 {offsets = [0, 0], sizes = [2, 128], strides = [1, 1]} : vector<2x512xf32> to vector<2x128xf32>
    %216 = arith.negf %215 : vector<2x128xf32>
    %217 = math.exp %216 : vector<2x128xf32>
    %cst_41 = arith.constant 1.000000e+00 : f32
    %218 = vector.broadcast %cst_41 : f32 to vector<2x128xf32>
    %219 = arith.addf %218, %217 : vector<2x128xf32>
    %220 = arith.divf %218, %219 : vector<2x128xf32>
    %221 = vector.extract_strided_slice %214 {offsets = [0, 128], sizes = [2, 128], strides = [1, 1]} : vector<2x512xf32> to vector<2x128xf32>
    %222 = arith.negf %221 : vector<2x128xf32>
    %223 = math.exp %222 : vector<2x128xf32>
    %cst_42 = arith.constant 1.000000e+00 : f32
    %224 = vector.broadcast %cst_42 : f32 to vector<2x128xf32>
    %225 = arith.addf %224, %223 : vector<2x128xf32>
    %226 = arith.divf %224, %225 : vector<2x128xf32>
    %227 = vector.extract_strided_slice %214 {offsets = [0, 256], sizes = [2, 128], strides = [1, 1]} : vector<2x512xf32> to vector<2x128xf32>
    %228 = math.tanh %227 : vector<2x128xf32>
    %229 = vector.extract_strided_slice %214 {offsets = [0, 384], sizes = [2, 128], strides = [1, 1]} : vector<2x512xf32> to vector<2x128xf32>
    %230 = arith.negf %229 : vector<2x128xf32>
    %231 = math.exp %230 : vector<2x128xf32>
    %cst_43 = arith.constant 1.000000e+00 : f32
    %232 = vector.broadcast %cst_43 : f32 to vector<2x128xf32>
    %233 = arith.addf %232, %231 : vector<2x128xf32>
    %234 = arith.divf %232, %233 : vector<2x128xf32>
    %235 = arith.mulf %226, %209 : vector<2x128xf32>
    %236 = arith.mulf %220, %228 : vector<2x128xf32>
    %237 = arith.addf %235, %236 : vector<2x128xf32>
    %238 = math.tanh %237 : vector<2x128xf32>
    %239 = arith.mulf %234, %238 : vector<2x128xf32>
    %c0_44 = arith.constant 0 : index
    %c0_45 = arith.constant 0 : index
    %240 = vector.load %arg5[%c0_44, %c0_45] : memref<128x128xf32, #tpu.memory_space<vmem>>, vector<128x128xf32>
    %cst_46 = arith.constant dense<0.000000e+00> : vector<2x128xf32>
    %241 = tpu.matmul %239, %240, %cst_46 {dimension_numbers = #tpu.dot_dimension_numbers<[1], [0], [0], [1], [0, 0, 1, 1], [], []>} : vector<2x128xf32>, vector<128x128xf32>, vector<2x128xf32> -> vector<2x128xf32>
    %c0_47 = arith.constant 0 : index
    %c0_48 = arith.constant 0 : index
    %242 = vector.load %arg6[%c0_47, %c0_48] : memref<1x128xf32, #tpu.memory_space<vmem>>, vector<1x128xf32>
    %243 = vector.broadcast %242 : vector<1x128xf32> to vector<2x128xf32>
    %244 = arith.addf %241, %243 : vector<2x128xf32>
    %c0_49 = arith.constant 0 : index
    %c0_50 = arith.constant 0 : index
    %245 = vector.load %arg7[%c0_49, %c0_50] : memref<2x128xf32, #tpu.memory_space<vmem>>, vector<2x128xf32>
    tpu.vector_store %arg7[%c0_49, %c0_50], %244 {strides = array<i32>} : memref<2x128xf32, #tpu.memory_space<vmem>>, vector<2x128xf32>,
    return
  }
}

</mosaic_0001>

<bundles_post_ra>
// kernel: tpu_custom_call.1
= control target key start
LH: loop header
LB: loop body
LE: loop exit
PB: predicated region body
PF: predicated region fallthrough
CT: control target
= control target key end

     0   :  { %12 = vsyncpa [#allocation3], 0  ;;  %s3007_s0 = inlined_call_operand.vmem [shape: s32[16,1], index: 0, kind: input, shape index: {}]   ;;  %s3008_s1 = inlined_call_operand.hbm [shape: f32[128,128], index: 1, kind: input, shape index: {}]   ;;  %s3009_s2 = inlined_call_operand.hbm [shape: f32[128,512], index: 2, kind: input, shape index: {}]   ;;  %s3010_s3 = inlined_call_operand.hbm [shape: f32[128,512], index: 3, kind: input, shape index: {}]   ;;  %s3011_s4 = inlined_call_operand.vmem [shape: f32[1,512], index: 4, kind: input, shape index: {}]   ;;  %s3012_s5 = inlined_call_operand.hbm [shape: f32[128,128], index: 5, kind: input, shape index: {}]   ;;  %s3013_s6 = inlined_call_operand.vmem [shape: f32[1,128], index: 6, kind: input, shape index: {}]   ;;  %s3014_s7 = inlined_call_operand.hbm [shape: f32[2,128], index: 7, kind: output, shape index: {}]  }
   0x1   :  { %13 = vsyncpa [#allocation6], 0 }
   0x2   :  { %14 = vsyncpa [#allocation9], 0  ;;  %s35_s26 = sshll.u32 %s3009_s2, 4  ;;  %s36_s26 = int_to_ptr.hbm [resolvable:$true] %s35_s26 }
   0x3   :  { %15 = vsyncpa [#allocation4], 0  ;;  %s2084_s27 = smov [#allocation5]   ;;  %s22_s8 = sshll.u32 %s3008_s1, 4  ;;  %s23_s8 = int_to_ptr.hbm [resolvable:$true] %s22_s8 }
   0x4   :  { %s37_s28 = sshll.u32 %s2084_s27, 4  ;;  %s2085_s9 = smov 512   ;;  %s38_s28 = int_to_ptr.vmem [resolvable:$true] %s37_s28 }
   0x5   :  { %s2086_s10 = smov 32   ;;  %s2087_s11 = smov [#allocation2]  }
   0x6   :  { %43 = dma.hbm_to_vmem [thread:$0]  %s36_s26, 8192, %s38_s28, [#allocation6], %s2085_s9, %s2085_s9, %s2086_s10  }
   0x7   :  { %s24_s12 = sshll.u32 %s2087_s11, 4  ;;  %s2088_s13 = smov 128   ;;  %s25_s12 = int_to_ptr.vmem [resolvable:$true] %s24_s12 }
   0x8   :  { %s2089_s14 = smov 8   ;;  %s48_s16 = sshll.u32 %s3010_s3, 4  ;;  %s49_s16 = int_to_ptr.hbm [resolvable:$true] %s48_s16 }
   0x9   :  { %30 = dma.hbm_to_vmem [thread:$0]  %s23_s8, 2048, %s25_s12, [#allocation3], %s2088_s13, %s2088_s13, %s2089_s14  }
   0xa   :  { %s2090_s17 = smov [#allocation7]   ;;  %s63_s20 = sshll.u32 %s3012_s5, 4  ;;  %s64_s20 = int_to_ptr.hbm [resolvable:$true] %s63_s20 }
   0xb   :  { %s50_s18 = sshll.u32 %s2090_s17, 4  ;;  %s2091_s21 = smov [#allocation8]   ;;  %s51_s18 = int_to_ptr.vmem [resolvable:$true] %s50_s18 }
   0xc   :  { %56 = dma.hbm_to_vmem [thread:$0]  %s49_s16, 8192, %s51_s18, [#allocation6], %s2085_s9, %s2085_s9, %s2086_s10  }
   0xd   :  { %s65_s22 = sshll.u32 %s2091_s21, 4  ;;  %s66_s22 = int_to_ptr.vmem [resolvable:$true] %s65_s22 }
   0xe   :  { %71 = dma.hbm_to_vmem [thread:$0]  %s64_s20, 2048, %s66_s22, [#allocation9], %s2088_s13, %s2088_s13, %s2089_s14  }
   0xf   :  { %2076 = dma.done.wait [#allocation3], 2048  }
  0x10   :  { %2077 = vsyncadd [#allocation3], 4294965248 }
  0x11   :  { %2078 = dma.done.wait [#allocation6], 16384  }
  0x12   :  { %2079 = vsyncadd [#allocation6], 4294950912 }
  0x13   :  { %2080 = dma.done.wait [#allocation9], 2048  }
  0x14   :  { %2081 = vsyncadd [#allocation9], 4294965248  ;;  %v2092_v0 = vmov 0   ;;  %v90_v1 = vld [vmem:[%s3007_s0] sm:$0xff]  ;;  %v121_v2 = vld [vmem:[#allocation2 + $0x78] sm:$0xff]  ;;  %v92_v53 = vlaneseq  ;;  %s2095_s27 = smov [#allocation10]  }
  0x15   :  { %1762 = vset.pattern.permute.xlu0 %v2092_v0  ;;  %122 = vmatpush.msra.mxu0 %v121_v2  ;;  %v120_v3 = vld [vmem:[#allocation2 + $0x70] sm:$0xff]  ;;  %v119_v4 = vld [vmem:[#allocation2 + $0x68] sm:$0xff]  ;;  %v118_v5 = vld [vmem:[#allocation2 + $0x60] sm:$0xff]  ;;  %s1708_s28 = sshll.u32 %s2095_s27, 4  ;;  %s1710_s8 = sshll.u32 %s3014_s7, 4  ;;  %s1709_s28 = int_to_ptr.vmem [resolvable:$true] %s1708_s28  ;;  %s1711_s8 = int_to_ptr.hbm [resolvable:$true] %s1710_s8 }
  0x16   :  { %95 = vperm.xlu0 %1762, %v90_v1   ;;  %v91_v6 = vld [vmem:[%s3007_s0 + $0x8] sm:$0xff]  ;;  %v117_v7 = vld [vmem:[#allocation2 + $0x58] sm:$0xff]  ;;  %v116_v8 = vld [vmem:[#allocation2 + $0x50] sm:$0xff]  ;;  %v93_v62 = vand.u32 127, %v92_v53 }
  0x17   :  { %123 = vmatpush.msra.mxu0 %v120_v3  ;;  %v115_v9 = vld [vmem:[#allocation2 + $0x48] sm:$0xff]  ;;  %v114_v10 = vld [vmem:[#allocation2 + $0x40] sm:$0xff]  ;;  %v113_v11 = vld [vmem:[#allocation2 + $0x38] sm:$0xff] }
  0x18   :  { %v112_v12 = vld [vmem:[#allocation2 + $0x30] sm:$0xff]  ;;  %v111_v13 = vld [vmem:[#allocation2 + $0x28] sm:$0xff]  ;;  %v110_v14 = vld [vmem:[#allocation2 + $0x20] sm:$0xff] }
  0x19   :  { %124 = vmatpush.msra.mxu0 %v119_v4  ;;  %v109_v15 = vld [vmem:[#allocation2 + $0x18] sm:$0xff]  ;;  %v108_v16 = vld [vmem:[#allocation2 + $0x10] sm:$0xff]  ;;  %v107_v17 = vld [vmem:[#allocation2 + $0x8] sm:$0xff] }
  0x1a   :  { %v106_v18 = vld [vmem:[#allocation2] sm:$0xff]  ;;  %v206_v20 = vld [vmem:[#allocation5 + $0x1e8] sm:$0xff]  ;;  %v207_v21 = vld [vmem:[#allocation5 + $0x1f0] sm:$0xff] }
  0x1b   :  { %125 = vmatpush.msra.mxu0 %v118_v5  ;;  %v205_v19 = vld [vmem:[#allocation5 + $0x1e0] sm:$0xff]  ;;  %242 = vmatpush.msra.mxu2 %v206_v20  ;;  %v208_v22 = vld [vmem:[#allocation5 + $0x1f8] sm:$0xff]  ;;  %v202_v24 = vld [vmem:[#allocation5 + $0x1c8] sm:$0xff] }
  0x1c   :  { %219 = vmatpush.msra.mxu1 %v205_v19  ;;  %v201_v23 = vld [vmem:[#allocation5 + $0x1c0] sm:$0xff]  ;;  %265 = vmatpush.msra.mxu3 %v207_v21  ;;  %v203_v25 = vld [vmem:[#allocation5 + $0x1d0] sm:$0xff]  ;;  %v204_v26 = vld [vmem:[#allocation5 + $0x1d8] sm:$0xff] }
  0x1d   :  { %126 = vmatpush.msra.mxu0 %v117_v7  ;;  %v197_v27 = vld [vmem:[#allocation5 + $0x1a0] sm:$0xff]  ;;  %243 = vmatpush.msra.mxu2 %v202_v24  ;;  %v198_v28 = vld [vmem:[#allocation5 + $0x1a8] sm:$0xff]  ;;  %v199_v29 = vld [vmem:[#allocation5 + $0x1b0] sm:$0xff] }
  0x1e   :  { %98 = vperm.xlu0 %1762, %v91_v6   ;;  %220 = vmatpush.msra.mxu1 %v201_v23  ;;  %v200_v30 = vld [vmem:[#allocation5 + $0x1b8] sm:$0xff]  ;;  %v193_v31 = vld [vmem:[#allocation5 + $0x180] sm:$0xff]  ;;  %v194_v32 = vld [vmem:[#allocation5 + $0x188] sm:$0xff] }
  0x1f   :  { %127 = vmatpush.msra.mxu0 %v116_v8  ;;  %266 = vmatpush.msra.mxu3 %v203_v25  ;;  %v195_v33 = vld [vmem:[#allocation5 + $0x190] sm:$0xff]  ;;  %v196_v34 = vld [vmem:[#allocation5 + $0x198] sm:$0xff]  ;;  %v189_v35 = vld [vmem:[#allocation5 + $0x160] sm:$0xff] }
  0x20   :  { %221 = vmatpush.msra.mxu1 %v197_v27  ;;  %244 = vmatpush.msra.mxu2 %v198_v28  ;;  %v190_v36 = vld [vmem:[#allocation5 + $0x168] sm:$0xff]  ;;  %v191_v37 = vld [vmem:[#allocation5 + $0x170] sm:$0xff]  ;;  %v192_v38 = vld [vmem:[#allocation5 + $0x178] sm:$0xff] }
  0x21   :  { %128 = vmatpush.msra.mxu0 %v115_v9  ;;  %267 = vmatpush.msra.mxu3 %v199_v29  ;;  %v185_v39 = vld [vmem:[#allocation5 + $0x140] sm:$0xff]  ;;  %v186_v40 = vld [vmem:[#allocation5 + $0x148] sm:$0xff]  ;;  %v187_v41 = vld [vmem:[#allocation5 + $0x150] sm:$0xff]  ;;  %v2093_v9 = vmov 1.0  }
  0x22   :  { %222 = vmatpush.msra.mxu1 %v193_v31  ;;  %245 = vmatpush.msra.mxu2 %v194_v32  ;;  %v188_v42 = vld [vmem:[#allocation5 + $0x158] sm:$0xff]  ;;  %v181_v43 = vld [vmem:[#allocation5 + $0x120] sm:$0xff]  ;;  %v182_v44 = vld [vmem:[#allocation5 + $0x128] sm:$0xff] }
  0x23   :  { %129 = vmatpush.msra.mxu0 %v114_v10  ;;  %268 = vmatpush.msra.mxu3 %v195_v33  ;;  %v183_v45 = vld [vmem:[#allocation5 + $0x130] sm:$0xff]  ;;  %v184_v46 = vld [vmem:[#allocation5 + $0x138] sm:$0xff]  ;;  %v177_v47 = vld [vmem:[#allocation5 + $0x100] sm:$0xff] }
  0x24   :  { %223 = vmatpush.msra.mxu1 %v189_v35  ;;  %246 = vmatpush.msra.mxu2 %v190_v36  ;;  %v178_v48 = vld [vmem:[#allocation5 + $0x108] sm:$0xff]  ;;  %v179_v49 = vld [vmem:[#allocation5 + $0x110] sm:$0xff]  ;;  %v180_v50 = vld [vmem:[#allocation5 + $0x118] sm:$0xff] }
  0x25   :  { %130 = vmatpush.msra.mxu0 %v113_v11  ;;  %269 = vmatpush.msra.mxu3 %v191_v37  ;;  %v173_v51 = vld [vmem:[#allocation5 + $0xe0] sm:$0xff]  ;;  %v174_v52 = vld [vmem:[#allocation5 + $0xe8] sm:$0xff]  ;;  %v175_v54 = vld [vmem:[#allocation5 + $0xf0] sm:$0xff] }
  0x26   :  { %224 = vmatpush.msra.mxu1 %v185_v39  ;;  %247 = vmatpush.msra.mxu2 %v186_v40  ;;  %v176_v55 = vld [vmem:[#allocation5 + $0xf8] sm:$0xff]  ;;  %v169_v56 = vld [vmem:[#allocation5 + $0xc0] sm:$0xff]  ;;  %v170_v57 = vld [vmem:[#allocation5 + $0xc8] sm:$0xff] }
  0x27   :  { %131 = vmatpush.msra.mxu0 %v112_v12  ;;  %270 = vmatpush.msra.mxu3 %v187_v41  ;;  %v171_v58 = vld [vmem:[#allocation5 + $0xd0] sm:$0xff]  ;;  %v172_v59 = vld [vmem:[#allocation5 + $0xd8] sm:$0xff]  ;;  %v165_v60 = vld [vmem:[#allocation5 + $0xa0] sm:$0xff] }
  0x28   :  { %225 = vmatpush.msra.mxu1 %v181_v43  ;;  %248 = vmatpush.msra.mxu2 %v182_v44  ;;  %v166_v61 = vld [vmem:[#allocation5 + $0xa8] sm:$0xff]  ;;  %v167_v63 = vld [vmem:[#allocation5 + $0xb0] sm:$0xff]  ;;  %v168_v0 = vld [vmem:[#allocation5 + $0xb8] sm:$0xff] }
  0x29   :  { %132 = vmatpush.msra.mxu0 %v111_v13  ;;  %271 = vmatpush.msra.mxu3 %v183_v45  ;;  %v161_v1 = vld [vmem:[#allocation5 + $0x80] sm:$0xff]  ;;  %v162_v2 = vld [vmem:[#allocation5 + $0x88] sm:$0xff]  ;;  %v163_v3 = vld [vmem:[#allocation5 + $0x90] sm:$0xff] }
  0x2a   :  { %226 = vmatpush.msra.mxu1 %v177_v47  ;;  %249 = vmatpush.msra.mxu2 %v178_v48  ;;  %v164_v5 = vld [vmem:[#allocation5 + $0x98] sm:$0xff]  ;;  %v157_v6 = vld [vmem:[#allocation5 + $0x60] sm:$0xff]  ;;  %v158_v7 = vld [vmem:[#allocation5 + $0x68] sm:$0xff] }
  0x2b   :  { %133 = vmatpush.msra.mxu0 %v110_v14  ;;  %272 = vmatpush.msra.mxu3 %v179_v49  ;;  %v159_v8 = vld [vmem:[#allocation5 + $0x70] sm:$0xff]  ;;  %v160_v10 = vld [vmem:[#allocation5 + $0x78] sm:$0xff]  ;;  %v153_v11 = vld [vmem:[#allocation5 + $0x40] sm:$0xff] }
  0x2c   :  { %227 = vmatpush.msra.mxu1 %v173_v51  ;;  %250 = vmatpush.msra.mxu2 %v174_v52  ;;  %v154_v12 = vld [vmem:[#allocation5 + $0x48] sm:$0xff]  ;;  %v155_v13 = vld [vmem:[#allocation5 + $0x50] sm:$0xff]  ;;  %v156_v14 = vld [vmem:[#allocation5 + $0x58] sm:$0xff] }
  0x2d   :  { %134 = vmatpush.msra.mxu0 %v109_v15  ;;  %273 = vmatpush.msra.mxu3 %v175_v54  ;;  %v149_v15 = vld [vmem:[#allocation5 + $0x20] sm:$0xff]  ;;  %v146_v20 = vld [vmem:[#allocation5 + $0x8] sm:$0xff]  ;;  %v148_v23 = vld [vmem:[#allocation5 + $0x18] sm:$0xff] }
  0x2e   :  { %228 = vmatpush.msra.mxu1 %v169_v56  ;;  %251 = vmatpush.msra.mxu2 %v170_v57  ;;  %v145_v19 = vld [vmem:[#allocation5] sm:$0xff]  ;;  %v2156_v25 = vld [vmem:[#allocation7 + $0x1e8] sm:$0xff]  ;;  %v2160_v27 = vld [vmem:[#allocation7 + $0x1f8] sm:$0xff] }
  0x2f   :  { %135 = vmatpush.msra.mxu0 %v108_v16  ;;  %274 = vmatpush.msra.mxu3 %v171_v58  ;;  %v150_v16 = vld [vmem:[#allocation5 + $0x28] sm:$0xff]  ;;  %v2154_v24 = vld [vmem:[#allocation7 + $0x1e0] sm:$0xff]  ;;  %v2170_v31 = vld [vmem:[#allocation7 + $0x1d8] sm:$0xff] }
  0x30   :  { %229 = vmatpush.msra.mxu1 %v165_v60  ;;  %252 = vmatpush.msra.mxu2 %v166_v61  ;;  %v2162_v28 = vld [vmem:[#allocation7 + $0x1c0] sm:$0xff]  ;;  %v2164_v29 = vld [vmem:[#allocation7 + $0x1c8] sm:$0xff]  ;;  %v2182_v35 = vld [vmem:[#allocation7 + $0x1b8] sm:$0xff] }
  0x31   :  { %136 = vmatpush.msra.mxu0 %v107_v17  ;;  %275 = vmatpush.msra.mxu3 %v167_v63  ;;  %v151_v17 = vld [vmem:[#allocation5 + $0x30] sm:$0xff]  ;;  %v2174_v32 = vld [vmem:[#allocation7 + $0x1a0] sm:$0xff]  ;;  %v2176_v33 = vld [vmem:[#allocation7 + $0x1a8] sm:$0xff] }
  0x32   :  { %230 = vmatpush.msra.mxu1 %v161_v1  ;;  %253 = vmatpush.msra.mxu2 %v162_v2  ;;  %v2186_v36 = vld [vmem:[#allocation7 + $0x180] sm:$0xff]  ;;  %v2188_v37 = vld [vmem:[#allocation7 + $0x188] sm:$0xff]  ;;  %v2194_v39 = vld [vmem:[#allocation7 + $0x198] sm:$0xff] }
  0x33   :  { %137 = vmatpush.msra.mxu0 %v106_v18  ;;  %276 = vmatpush.msra.mxu3 %v163_v3  ;;  %v152_v18 = vld [vmem:[#allocation5 + $0x38] sm:$0xff]  ;;  %v2198_v40 = vld [vmem:[#allocation7 + $0x160] sm:$0xff]  ;;  %v2200_v41 = vld [vmem:[#allocation7 + $0x168] sm:$0xff] }
  0x34   :  { %231 = vmatpush.msra.mxu1 %v157_v6  ;;  %254 = vmatpush.msra.mxu2 %v158_v7  ;;  %v2206_v43 = vld [vmem:[#allocation7 + $0x178] sm:$0xff]  ;;  %v2210_v44 = vld [vmem:[#allocation7 + $0x140] sm:$0xff]  ;;  %v2212_v45 = vld [vmem:[#allocation7 + $0x148] sm:$0xff] }
  0x35   :  { %288 = vmatpush.msrb.mxu0 %v208_v22  ;;  %277 = vmatpush.msra.mxu3 %v159_v8  ;;  %v147_v22 = vld [vmem:[#allocation5 + $0x10] sm:$0xff]  ;;  %v2218_v47 = vld [vmem:[#allocation7 + $0x158] sm:$0xff]  ;;  %v2222_v48 = vld [vmem:[#allocation7 + $0x120] sm:$0xff] }
  0x36   :  { %232 = vmatpush.msra.mxu1 %v153_v11  ;;  %255 = vmatpush.msra.mxu2 %v154_v12  ;;  %v2224_v49 = vld [vmem:[#allocation7 + $0x128] sm:$0xff]  ;;  %v2230_v51 = vld [vmem:[#allocation7 + $0x138] sm:$0xff]  ;;  %v2238_v52 = vld [vmem:[#allocation7 + $0x100] sm:$0xff] }
  0x37   :  { %289 = vmatpush.msrb.mxu0 %v204_v26  ;;  %278 = vmatpush.msra.mxu3 %v155_v13  ;;  %v2158_v26 = vld [vmem:[#allocation7 + $0x1f0] sm:$0xff]  ;;  %v2240_v53 = vld [vmem:[#allocation7 + $0x108] sm:$0xff]  ;;  %v2250_v56 = vld [vmem:[#allocation7 + $0xe0] sm:$0xff] }
  0x38   :  { %233 = vmatpush.msra.mxu1 %v149_v15  ;;  %256 = vmatpush.msra.mxu2 %v150_v16  ;;  %v2242_v54 = vld [vmem:[#allocation7 + $0x110] sm:$0xff]  ;;  %v2252_v57 = vld [vmem:[#allocation7 + $0xe8] sm:$0xff]  ;;  %v2260_v60 = vld [vmem:[#allocation7 + $0xc0] sm:$0xff] }
  0x39   :  { %290 = vmatpush.msrb.mxu0 %v200_v30  ;;  %279 = vmatpush.msra.mxu3 %v151_v17  ;;  %v2168_v30 = vld [vmem:[#allocation7 + $0x1d0] sm:$0xff]  ;;  %v2262_v61 = vld [vmem:[#allocation7 + $0xc8] sm:$0xff]  ;;  %v2268_v63 = vld [vmem:[#allocation7 + $0xd8] sm:$0xff] }
  0x3a   :  { %234 = vmatpush.msra.mxu1 %v145_v19  ;;  %257 = vmatpush.msra.mxu2 %v146_v20  ;;  %v2254_v58 = vld [vmem:[#allocation7 + $0xf0] sm:$0xff]  ;;  %3135 = vst [vmem:[#allocation16_spill] sm:$0xff] %v2268_v63  ;;  %v2274_v1 = vld [vmem:[#allocation7 + $0xa8] sm:$0xff]  ;;  %v2278_v3 = vld [vmem:[#allocation7 + $0xb8] sm:$0xff] }
  0x3b   :  { %291 = vmatpush.msrb.mxu0 %v196_v34  ;;  %280 = vmatpush.msra.mxu3 %v147_v22  ;;  %v2180_v34 = vld [vmem:[#allocation7 + $0x1b0] sm:$0xff]  ;;  %3137 = vst [vmem:[#allocation18_spill] sm:$0xff] %v2274_v1  ;;  %v2294_v7 = vld [vmem:[#allocation7 + $0x98] sm:$0xff]  ;;  %v2298_v8 = vld [vmem:[#allocation7 + $0x60] sm:$0xff] }
  0x3c   :  { %375 = vmatpush.msrb.mxu1 %v2154_v24  ;;  %395 = vmatpush.msrb.mxu2 %v2156_v25  ;;  %v2276_v2 = vld [vmem:[#allocation7 + $0xb0] sm:$0xff]  ;;  %3139 = vst [vmem:[#allocation20_spill] sm:$0xff] %v2278_v3  ;;  %v2306_v11 = vld [vmem:[#allocation7 + $0x78] sm:$0xff]  ;;  %v2308_v12 = vld [vmem:[#allocation7 + $0x40] sm:$0xff] }
  0x3d   :  { %292 = vmatpush.msrb.mxu0 %v192_v38  ;;  %415 = vmatpush.msrb.mxu3 %v2158_v26  ;;  %v2192_v38 = vld [vmem:[#allocation7 + $0x190] sm:$0xff]  ;;  %3138 = vst [vmem:[#allocation19_spill] sm:$0xff] %v2276_v2  ;;  %v2310_v13 = vld [vmem:[#allocation7 + $0x48] sm:$0xff]  ;;  %v2316_v15 = vld [vmem:[#allocation7 + $0x58] sm:$0xff] }
  0x3e   :  { %376 = vmatpush.msrb.mxu1 %v2162_v28  ;;  %396 = vmatpush.msrb.mxu2 %v2164_v29  ;;  %v2290_v6 = vld [vmem:[#allocation7 + $0x90] sm:$0xff]  ;;  %3143 = vst [vmem:[#allocation24_spill] sm:$0xff] %v2294_v7  ;;  %v2318_v16 = vld [vmem:[#allocation7 + $0x20] sm:$0xff]  ;;  %v2322_v17 = vld [vmem:[#allocation7 + $0x28] sm:$0xff] }
  0x3f   :  { %293 = vmatpush.msrb.mxu0 %v188_v42  ;;  %416 = vmatpush.msrb.mxu3 %v2168_v30  ;;  %v2204_v42 = vld [vmem:[#allocation7 + $0x170] sm:$0xff]  ;;  %3142 = vst [vmem:[#allocation23_spill] sm:$0xff] %v2290_v6  ;;  %v2326_v19 = vld [vmem:[#allocation7 + $0x38] sm:$0xff]  ;;  %v2330_v20 = vld [vmem:[#allocation7] sm:$0xff] }
  0x40   :  { %377 = vmatpush.msrb.mxu1 %v2174_v32  ;;  %397 = vmatpush.msrb.mxu2 %v2176_v33  ;;  %3144 = vst [vmem:[#allocation25_spill] sm:$0xff] %v2298_v8  ;;  %v2336_v22 = vld [vmem:[#allocation7 + $0x10] sm:$0xff] }
  0x41   :  { %294 = vmatpush.msrb.mxu0 %v184_v46  ;;  %417 = vmatpush.msrb.mxu3 %v2180_v34  ;;  %v2216_v46 = vld [vmem:[#allocation7 + $0x150] sm:$0xff]  ;;  %3147 = vst [vmem:[#allocation28_spill] sm:$0xff] %v2306_v11 }
  0x42   :  { %378 = vmatpush.msrb.mxu1 %v2186_v36  ;;  %398 = vmatpush.msrb.mxu2 %v2188_v37  ;;  %3148 = vst [vmem:[#allocation29_spill] sm:$0xff] %v2308_v12 }
  0x43   :  { %295 = vmatpush.msrb.mxu0 %v180_v50  ;;  %418 = vmatpush.msrb.mxu3 %v2192_v38  ;;  %v2228_v50 = vld [vmem:[#allocation7 + $0x130] sm:$0xff]  ;;  %3149 = vst [vmem:[#allocation30_spill] sm:$0xff] %v2310_v13 }
  0x44   :  { %379 = vmatpush.msrb.mxu1 %v2198_v40  ;;  %399 = vmatpush.msrb.mxu2 %v2200_v41  ;;  %3151 = vst [vmem:[#allocation32_spill] sm:$0xff] %v2316_v15 }
  0x45   :  { %296 = vmatpush.msrb.mxu0 %v176_v55  ;;  %419 = vmatpush.msrb.mxu3 %v2204_v42  ;;  %v2246_v55 = vld [vmem:[#allocation7 + $0x118] sm:$0xff]  ;;  %3152 = vst [vmem:[#allocation33_spill] sm:$0xff] %v2318_v16 }
  0x46   :  { %380 = vmatpush.msrb.mxu1 %v2210_v44  ;;  %400 = vmatpush.msrb.mxu2 %v2212_v45  ;;  %3153 = vst [vmem:[#allocation34_spill] sm:$0xff] %v2322_v17 }
  0x47   :  { %297 = vmatpush.msrb.mxu0 %v172_v59  ;;  %420 = vmatpush.msrb.mxu3 %v2216_v46  ;;  %v2258_v59 = vld [vmem:[#allocation7 + $0xf8] sm:$0xff]  ;;  %3155 = vst [vmem:[#allocation36_spill] sm:$0xff] %v2326_v19 }
  0x48   :  { %381 = vmatpush.msrb.mxu1 %v2222_v48  ;;  %401 = vmatpush.msrb.mxu2 %v2224_v49  ;;  %3156 = vst [vmem:[#allocation37_spill] sm:$0xff] %v2330_v20 }
  0x49   :  { %298 = vmatpush.msrb.mxu0 %v168_v0  ;;  %421 = vmatpush.msrb.mxu3 %v2228_v50  ;;  %v2270_v0 = vld [vmem:[#allocation7 + $0xa0] sm:$0xff]  ;;  %3158 = vst [vmem:[#allocation39_spill] sm:$0xff] %v2336_v22 }
  0x4a   :  { %382 = vmatpush.msrb.mxu1 %v2238_v52  ;;  %402 = vmatpush.msrb.mxu2 %v2240_v53  ;;  %3136 = vst [vmem:[#allocation17_spill] sm:$0xff] %v2270_v0 }
  0x4b   :  { %299 = vmatpush.msrb.mxu0 %v164_v5  ;;  %422 = vmatpush.msrb.mxu3 %v2242_v54  ;;  %v2288_v5 = vld [vmem:[#allocation7 + $0x88] sm:$0xff] }
  0x4c   :  { %383 = vmatpush.msrb.mxu1 %v2250_v56  ;;  %403 = vmatpush.msrb.mxu2 %v2252_v57  ;;  %3141 = vst [vmem:[#allocation22_spill] sm:$0xff] %v2288_v5 }
  0x4d   :  { %300 = vmatpush.msrb.mxu0 %v160_v10  ;;  %423 = vmatpush.msrb.mxu3 %v2254_v58  ;;  %v2302_v10 = vld [vmem:[#allocation7 + $0x70] sm:$0xff] }
  0x4e   :  { %384 = vmatpush.msrb.mxu1 %v2260_v60  ;;  %404 = vmatpush.msrb.mxu2 %v2262_v61  ;;  %3146 = vst [vmem:[#allocation27_spill] sm:$0xff] %v2302_v10 }
  0x4f   :  { %301 = vmatpush.msrb.mxu0 %v156_v14  ;;  %v2314_v14 = vld [vmem:[#allocation7 + $0x50] sm:$0xff] }
  0x50   :  { %385 = vmatpush.msrb.mxu1 %v2270_v0  ;;  %405 = vmatpush.msrb.mxu2 %v2274_v1  ;;  %3150 = vst [vmem:[#allocation31_spill] sm:$0xff] %v2314_v14 }
  0x51   :  { %302 = vmatpush.msrb.mxu0 %v152_v18  ;;  %v2324_v18 = vld [vmem:[#allocation7 + $0x30] sm:$0xff] }
  0x52   :  { %406 = vmatpush.msrb.mxu2 %v2288_v5  ;;  %3154 = vst [vmem:[#allocation35_spill] sm:$0xff] %v2324_v18 }
  0x53   :  { %303 = vmatpush.msrb.mxu0 %v148_v23  ;;  %v2338_v23 = vld [vmem:[#allocation7 + $0x18] sm:$0xff] }
  0x54   :  { %3159 = vst [vmem:[#allocation40_spill] sm:$0xff] %v2338_v23 }
  0x88   :  { %v96_v4 = vpop.permute.xlu0 %95 }
  0x89   :  { %vm100_vm0 = vcmp.eq.s32.totalorder %v93_v62, %v96_v4  ;;  %v2286_v4 = vld [vmem:[#allocation7 + $0x80] sm:$0xff] }
  0x8a   :  { %1724 = vmatmul.msk.f32.vlgmr.msra.gmra.mxu0 %vm100_vm0, %v2093_v9  ;;  %3140 = vst [vmem:[#allocation21_spill] sm:$0xff] %v2286_v4  ;;  %386 = vmatpush.msrb.mxu1 %v2286_v4 }
  0x8b   :  { %435 = vmatpush.msra.mxu0 %v2160_v27 }
  0x8c   :  { %387 = vmatpush.msrb.mxu1 %v2298_v8 }
  0x8d   :  { %436 = vmatpush.msra.mxu0 %v2170_v31 }
  0x8e   :  { %388 = vmatpush.msrb.mxu1 %v2308_v12 }
  0x8f   :  { %437 = vmatpush.msra.mxu0 %v2182_v35 }
  0x90   :  { %v99_v21 = vpop.permute.xlu0 %98  ;;  %389 = vmatpush.msrb.mxu1 %v2318_v16 }
  0x91   :  { %vm101_vm1 = vcmp.eq.s32.totalorder %v93_v62, %v99_v21  ;;  %438 = vmatpush.msra.mxu0 %v2194_v39  ;;  %v2266_v62 = vld [vmem:[#allocation7 + $0xd0] sm:$0xff]  ;;  %v2332_v21 = vld [vmem:[#allocation7 + $0x8] sm:$0xff] }
  0x92   :  { %1725 = vmatmul.msk.f32.gmra.mxu0 %vm101_vm1, %v2093_v9  ;;  %3134 = vst [vmem:[#allocation15_spill] sm:$0xff] %v2266_v62  ;;  %424 = vmatpush.msrb.mxu3 %v2266_v62  ;;  %v2300_v9 = vld [vmem:[#allocation7 + $0x68] sm:$0xff] }
  0x93   :  { %439 = vmatpush.msra.mxu0 %v2206_v43  ;;  %3145 = vst [vmem:[#allocation26_spill] sm:$0xff] %v2300_v9  ;;  %407 = vmatpush.msrb.mxu2 %v2300_v9 }
  0x94   :  { %425 = vmatpush.msrb.mxu3 %v2276_v2  ;;  %3157 = vst [vmem:[#allocation38_spill] sm:$0xff] %v2332_v21  ;;  %390 = vmatpush.msrb.mxu1 %v2330_v20 }
  0x95   :  { %440 = vmatpush.msra.mxu0 %v2218_v47  ;;  %408 = vmatpush.msrb.mxu2 %v2310_v13 }
  0x96   :  { %426 = vmatpush.msrb.mxu3 %v2290_v6 }
  0x97   :  { %441 = vmatpush.msra.mxu0 %v2230_v51  ;;  %409 = vmatpush.msrb.mxu2 %v2322_v17 }
  0x98   :  { %427 = vmatpush.msrb.mxu3 %v2302_v10 }
  0x99   :  { %442 = vmatpush.msra.mxu0 %v2246_v55  ;;  %410 = vmatpush.msrb.mxu2 %v2332_v21 }
  0x9a   :  { %428 = vmatpush.msrb.mxu3 %v2314_v14 }
  0x9b   :  { %443 = vmatpush.msra.mxu0 %v2258_v59 }
  0x9c   :  { %429 = vmatpush.msrb.mxu3 %v2324_v18 }
  0x9d   :  { %444 = vmatpush.msra.mxu0 %v2268_v63 }
  0x9e   :  { %430 = vmatpush.msrb.mxu3 %v2336_v22 }
  0x9f   :  { %445 = vmatpush.msra.mxu0 %v2278_v3 }
  0xa1   :  { %446 = vmatpush.msra.mxu0 %v2294_v7 }
  0xa3   :  { %447 = vmatpush.msra.mxu0 %v2306_v11 }
  0xa5   :  { %448 = vmatpush.msra.mxu0 %v2316_v15 }
  0xa7   :  { %449 = vmatpush.msra.mxu0 %v2326_v19 }
  0xa9   :  { %450 = vmatpush.msra.mxu0 %v2338_v23 }
 0x107   :  { %v139_v15 = vpop.f32.mrf.mxu0 }
 0x108   :  { %235 = vmatmul.f32.vlgmr.msra.gmra.mxu1 %v139_v15  ;;  %258 = vmatmul.f32.vlgmr.msra.gmra.mxu2 %v139_v15 }
 0x109   :  { %281 = vmatmul.f32.vlgmr.msra.gmra.mxu3 %v139_v15  ;;  %304 = vmatmul.f32.vlgmr.msrb.gmra.mxu0 %v139_v15 }
 0x10a   :  { %522 = vmatpush.msra.mxu1 %v2154_v24  ;;  %542 = vmatpush.msra.mxu2 %v2156_v25 }
 0x10b   :  { %562 = vmatpush.msra.mxu3 %v2158_v26  ;;  %582 = vmatpush.msrb.mxu0 %v2160_v27 }
 0x10c   :  { %523 = vmatpush.msra.mxu1 %v2162_v28  ;;  %543 = vmatpush.msra.mxu2 %v2164_v29 }
 0x10d   :  { %563 = vmatpush.msra.mxu3 %v2168_v30  ;;  %583 = vmatpush.msrb.mxu0 %v2170_v31 }
 0x10e   :  { %524 = vmatpush.msra.mxu1 %v2174_v32  ;;  %544 = vmatpush.msra.mxu2 %v2176_v33 }
 0x10f   :  { %v142_v15 = vpop.f32.mrf.mxu0  ;;  %564 = vmatpush.msra.mxu3 %v2180_v34  ;;  %584 = vmatpush.msrb.mxu0 %v2182_v35 }
 0x110   :  { %238 = vmatmul.f32.gmra.mxu1 %v142_v15  ;;  %261 = vmatmul.f32.gmra.mxu2 %v142_v15 }
 0x111   :  { %284 = vmatmul.f32.gmra.mxu3 %v142_v15  ;;  %307 = vmatmul.f32.gmra.mxu0 %v142_v15  ;;  %v2094_v15 = vmov 0.0  }
 0x112   :  { %525 = vmatpush.msra.mxu1 %v2186_v36  ;;  %545 = vmatpush.msra.mxu2 %v2188_v37 }
 0x113   :  { %565 = vmatpush.msra.mxu3 %v2192_v38  ;;  %585 = vmatpush.msrb.mxu0 %v2194_v39 }
 0x114   :  { %526 = vmatpush.msra.mxu1 %v2198_v40  ;;  %546 = vmatpush.msra.mxu2 %v2200_v41 }
 0x115   :  { %566 = vmatpush.msra.mxu3 %v2204_v42  ;;  %586 = vmatpush.msrb.mxu0 %v2206_v43 }
 0x116   :  { %527 = vmatpush.msra.mxu1 %v2210_v44  ;;  %547 = vmatpush.msra.mxu2 %v2212_v45 }
 0x117   :  { %567 = vmatpush.msra.mxu3 %v2216_v46  ;;  %587 = vmatpush.msrb.mxu0 %v2218_v47 }
 0x118   :  { %391 = vmatmul.f32.vlgmr.msrb.gmra.mxu1 %v2094_v15  ;;  %411 = vmatmul.f32.vlgmr.msrb.gmra.mxu2 %v2094_v15 }
 0x119   :  { %431 = vmatmul.f32.vlgmr.msrb.gmra.mxu3 %v2094_v15  ;;  %451 = vmatmul.f32.vlgmr.msra.gmra.mxu0 %v2094_v15  ;;  %v3160_v15 = vld [vmem:[#allocation32_spill] sm:$0xff] }
 0x11a   :  { %528 = vmatpush.msra.mxu1 %v2222_v48  ;;  %548 = vmatpush.msra.mxu2 %v2224_v49 }
 0x11b   :  { %568 = vmatpush.msra.mxu3 %v2228_v50  ;;  %588 = vmatpush.msrb.mxu0 %v2230_v51 }
 0x11c   :  { %529 = vmatpush.msra.mxu1 %v2238_v52  ;;  %549 = vmatpush.msra.mxu2 %v2240_v53 }
 0x11d   :  { %569 = vmatpush.msra.mxu3 %v2242_v54  ;;  %589 = vmatpush.msrb.mxu0 %v2246_v55 }
 0x11e   :  { %530 = vmatpush.msra.mxu1 %v2250_v56  ;;  %550 = vmatpush.msra.mxu2 %v2252_v57 }
 0x11f   :  { %570 = vmatpush.msra.mxu3 %v2254_v58  ;;  %590 = vmatpush.msrb.mxu0 %v2258_v59 }
 0x120   :  { %531 = vmatpush.msra.mxu1 %v2260_v60  ;;  %551 = vmatpush.msra.mxu2 %v2262_v61 }
 0x121   :  { %571 = vmatpush.msra.mxu3 %v2266_v62  ;;  %591 = vmatpush.msrb.mxu0 %v2268_v63 }
 0x122   :  { %532 = vmatpush.msra.mxu1 %v2270_v0  ;;  %552 = vmatpush.msra.mxu2 %v2274_v1 }
 0x123   :  { %572 = vmatpush.msra.mxu3 %v2276_v2  ;;  %592 = vmatpush.msrb.mxu0 %v2278_v3 }
 0x124   :  { %533 = vmatpush.msra.mxu1 %v2286_v4  ;;  %553 = vmatpush.msra.mxu2 %v2288_v5 }
 0x125   :  { %573 = vmatpush.msra.mxu3 %v2290_v6  ;;  %593 = vmatpush.msrb.mxu0 %v2294_v7 }
 0x126   :  { %534 = vmatpush.msra.mxu1 %v2298_v8  ;;  %554 = vmatpush.msra.mxu2 %v2300_v9 }
 0x127   :  { %574 = vmatpush.msra.mxu3 %v2302_v10  ;;  %594 = vmatpush.msrb.mxu0 %v2306_v11 }
 0x128   :  { %535 = vmatpush.msra.mxu1 %v2308_v12  ;;  %555 = vmatpush.msra.mxu2 %v2310_v13 }
 0x129   :  { %575 = vmatpush.msra.mxu3 %v2314_v14  ;;  %595 = vmatpush.msrb.mxu0 %v3160_v15 }
 0x12a   :  { %536 = vmatpush.msra.mxu1 %v2318_v16  ;;  %556 = vmatpush.msra.mxu2 %v2322_v17 }
 0x12b   :  { %576 = vmatpush.msra.mxu3 %v2324_v18  ;;  %596 = vmatpush.msrb.mxu0 %v2326_v19 }
 0x12c   :  { %537 = vmatpush.msra.mxu1 %v2330_v20  ;;  %557 = vmatpush.msra.mxu2 %v2332_v21 }
 0x12d   :  { %577 = vmatpush.msra.mxu3 %v2336_v22  ;;  %597 = vmatpush.msrb.mxu0 %v2338_v23 }
 0x12e   :  { %687 = vmatpush.msrb.mxu1 %v2154_v24  ;;  %707 = vmatpush.msrb.mxu2 %v2156_v25 }
 0x12f   :  { %727 = vmatpush.msrb.mxu3 %v2158_v26  ;;  %747 = vmatpush.msra.mxu0 %v2160_v27 }
 0x130   :  { %688 = vmatpush.msrb.mxu1 %v2162_v28  ;;  %708 = vmatpush.msrb.mxu2 %v2164_v29 }
 0x131   :  { %728 = vmatpush.msrb.mxu3 %v2168_v30  ;;  %748 = vmatpush.msra.mxu0 %v2170_v31 }
 0x132   :  { %689 = vmatpush.msrb.mxu1 %v2174_v32  ;;  %709 = vmatpush.msrb.mxu2 %v2176_v33 }
 0x133   :  { %729 = vmatpush.msrb.mxu3 %v2180_v34  ;;  %749 = vmatpush.msra.mxu0 %v2182_v35 }
 0x134   :  { %690 = vmatpush.msrb.mxu1 %v2186_v36  ;;  %710 = vmatpush.msrb.mxu2 %v2188_v37 }
 0x135   :  { %730 = vmatpush.msrb.mxu3 %v2192_v38  ;;  %750 = vmatpush.msra.mxu0 %v2194_v39 }
 0x136   :  { %691 = vmatpush.msrb.mxu1 %v2198_v40  ;;  %711 = vmatpush.msrb.mxu2 %v2200_v41 }
 0x137   :  { %731 = vmatpush.msrb.mxu3 %v2204_v42  ;;  %751 = vmatpush.msra.mxu0 %v2206_v43 }
 0x138   :  { %692 = vmatpush.msrb.mxu1 %v2210_v44  ;;  %712 = vmatpush.msrb.mxu2 %v2212_v45 }
 0x139   :  { %732 = vmatpush.msrb.mxu3 %v2216_v46  ;;  %752 = vmatpush.msra.mxu0 %v2218_v47 }
 0x13a   :  { %693 = vmatpush.msrb.mxu1 %v2222_v48  ;;  %713 = vmatpush.msrb.mxu2 %v2224_v49 }
 0x13b   :  { %733 = vmatpush.msrb.mxu3 %v2228_v50  ;;  %753 = vmatpush.msra.mxu0 %v2230_v51 }
 0x13c   :  { %694 = vmatpush.msrb.mxu1 %v2238_v52  ;;  %714 = vmatpush.msrb.mxu2 %v2240_v53 }
 0x13d   :  { %734 = vmatpush.msrb.mxu3 %v2242_v54  ;;  %754 = vmatpush.msra.mxu0 %v2246_v55 }
 0x13e   :  { %695 = vmatpush.msrb.mxu1 %v2250_v56  ;;  %715 = vmatpush.msrb.mxu2 %v2252_v57 }
 0x13f   :  { %735 = vmatpush.msrb.mxu3 %v2254_v58  ;;  %755 = vmatpush.msra.mxu0 %v2258_v59 }
 0x140   :  { %696 = vmatpush.msrb.mxu1 %v2260_v60  ;;  %716 = vmatpush.msrb.mxu2 %v2262_v61 }
 0x141   :  { %736 = vmatpush.msrb.mxu3 %v2266_v62  ;;  %756 = vmatpush.msra.mxu0 %v2268_v63 }
 0x142   :  { %697 = vmatpush.msrb.mxu1 %v2270_v0  ;;  %717 = vmatpush.msrb.mxu2 %v2274_v1 }
 0x143   :  { %737 = vmatpush.msrb.mxu3 %v2276_v2  ;;  %757 = vmatpush.msra.mxu0 %v2278_v3 }
 0x144   :  { %698 = vmatpush.msrb.mxu1 %v2286_v4  ;;  %718 = vmatpush.msrb.mxu2 %v2288_v5 }
 0x145   :  { %738 = vmatpush.msrb.mxu3 %v2290_v6  ;;  %758 = vmatpush.msra.mxu0 %v2294_v7 }
 0x146   :  { %699 = vmatpush.msrb.mxu1 %v2298_v8  ;;  %719 = vmatpush.msrb.mxu2 %v2300_v9 }
 0x147   :  { %739 = vmatpush.msrb.mxu3 %v2302_v10  ;;  %759 = vmatpush.msra.mxu0 %v2306_v11 }
 0x148   :  { %700 = vmatpush.msrb.mxu1 %v2308_v12  ;;  %720 = vmatpush.msrb.mxu2 %v2310_v13 }
 0x149   :  { %740 = vmatpush.msrb.mxu3 %v2314_v14  ;;  %760 = vmatpush.msra.mxu0 %v3160_v15 }
 0x14a   :  { %701 = vmatpush.msrb.mxu1 %v2318_v16  ;;  %721 = vmatpush.msrb.mxu2 %v2322_v17  ;;  %v209_v16 = vld [vmem:[%s3011_s4] sm:$0xf] }
 0x14b   :  { %741 = vmatpush.msrb.mxu3 %v2324_v18  ;;  %761 = vmatpush.msra.mxu0 %v2326_v19  ;;  %v211_v17 = vperm.slane %v209_v16, 0  ;;  %v214_v18 = vperm.slane %v209_v16, 3 }
 0x14c   :  { %702 = vmatpush.msrb.mxu1 %v2330_v20  ;;  %722 = vmatpush.msrb.mxu2 %v2332_v21  ;;  %v212_v21 = vperm.slane %v209_v16, 1 }
 0x14d   :  { %742 = vmatpush.msrb.mxu3 %v2336_v22  ;;  %762 = vmatpush.msra.mxu0 %v2338_v23  ;;  %v213_v22 = vperm.slane %v209_v16, 2 }
 0x185   :  { %v236_v13 = vpop.f32.mrf.mxu1 }
 0x186   :  { %v305_v14 = vpop.f32.mrf.mxu0  ;;  %v2481_v23 = vadd.f32 %v236_v13, %v211_v17 }
 0x187   :  { %v2485_v6 = vadd.f32 %v305_v14, %v214_v18 }
 0x188   :  { %3163 = vst [vmem:[#allocation43_spill] sm:$0xff] %v2481_v23 }
 0x189   :  { %3165 = vst [vmem:[#allocation45_spill] sm:$0xff] %v2485_v6 }
 0x18b   :  { %v259_v15 = vpop.f32.mrf.mxu2 }
 0x18c   :  { %v282_v12 = vpop.f32.mrf.mxu3  ;;  %v2491_v2 = vadd.f32 %v259_v15, %v212_v21 }
 0x18d   :  { %v239_v11 = vpop.f32.mrf.mxu1  ;;  %v2494_v15 = vadd.f32 %v282_v12, %v213_v22 }
 0x18e   :  { %v2477_v19 = vadd.f32 %v239_v11, %v211_v17  ;;  %v308_v20 = vpop.f32.mrf.mxu0  ;;  %3167 = vst [vmem:[#allocation47_spill] sm:$0xff] %v2491_v2 }
 0x18f   :  { %v2479_v10 = vadd.f32 %v308_v20, %v214_v18  ;;  %3168 = vst [vmem:[#allocation48_spill] sm:$0xff] %v2494_v15 }
 0x190   :  { %3161 = vst [vmem:[#allocation41_spill] sm:$0xff] %v2477_v19 }
 0x191   :  { %3162 = vst [vmem:[#allocation42_spill] sm:$0xff] %v2479_v10 }
 0x193   :  { %v262_v9 = vpop.f32.mrf.mxu2 }
 0x194   :  { %v2483_v8 = vadd.f32 %v262_v9, %v212_v21  ;;  %v285_v7 = vpop.f32.mrf.mxu3 }
 0x195   :  { %v2487_v5 = vadd.f32 %v285_v7, %v213_v22  ;;  %v392_v4 = vpop.f32.mrf.mxu1 }
 0x196   :  { %3164 = vst [vmem:[#allocation44_spill] sm:$0xff] %v2483_v8  ;;  %v455_v3 = vadd.f32 %v392_v4, %v2481_v23  ;;  %v452_v11 = vpop.f32.mrf.mxu0 }
 0x197   :  { %3166 = vst [vmem:[#allocation46_spill] sm:$0xff] %v2487_v5  ;;  %v458_v19 = vadd.f32 %v452_v11, %v2485_v6 }
 0x198   :  { %v1726_v20 = vmul.f32 -1.442695, %v455_v3 }
 0x199   :  { %v1728_v10 = vmul.f32 -1.442695, %v458_v19 }
 0x19a   :  { %1764 = vpow2.f32 %v1726_v20 }
 0x19b   :  { %1766 = vpow2.f32 %v1728_v10  ;;  %v412_v13 = vpop.f32.mrf.mxu2 }
 0x19c   :  { %v456_v9 = vadd.f32 %v412_v13, %v2491_v2  ;;  %v432_v21 = vpop.f32.mrf.mxu3 }
 0x19e   :  { %v1727_v16 = vmul.f32 -1.442695, %v456_v9  ;;  %v457_v9 = vadd.f32 %v432_v21, %v2494_v15 }
 0x1a0   :  { %v1765_v14 = vpop.eup %1764  ;;  %1768 = vpow2.f32 %v1727_v16 }
 0x1a1   :  { %v1767_v7 = vpop.eup %1766  ;;  %v462_v17 = vadd.f32 1.0, %v1765_v14 }
 0x1a2   :  { %v501_v18 = vadd.f32 1.0, %v1767_v7 }
 0x1a3   :  { %1770 = vrcp.f32 %v462_v17  ;;  %v474_v7 = vand.u32 2147483648, %v462_v17  ;;  %vm468_vm3 = vweird.f32 %v462_v17 }
 0x1a4   :  { %1772 = vrcp.f32 %v501_v18  ;;  %vm507_vm11 = vweird.f32 %v501_v18 }
 0x1a6   :  { %v1769_v4 = vpop.eup %1768 }
 0x1a7   :  { %v481_v5 = vadd.f32 1.0, %v1769_v4  ;;  %v472_v4 = vand.u32 2147483647, %v462_v17 }
 0x1a9   :  { %v1771_v11 = vpop.eup %1770  ;;  %1774 = vrcp.f32 %v481_v5  ;;  %v493_v6 = vand.u32 2147483648, %v481_v5  ;;  %v491_v12 = vand.u32 2147483647, %v481_v5  ;;  %vm487_vm6 = vweird.f32 %v481_v5 }
 0x1aa   :  { %v464_v3 = vmul.f32 %v1771_v11, %v462_v17  ;;  %v1773_v10 = vpop.eup %1772  ;;  %vm469_vm2 = vweird.f32 %v1771_v11  ;;  %1776 = vtanh.f32 %v457_v9  ;;  %vm473_vm7 = vcmp.eq.f32.partialorder %v472_v4, 8.507059e+37  ;;  %v3187_v4 = vld [vmem:[#allocation33_spill] sm:$0xff] }
 0x1ab   :  { %v503_v14 = vmul.f32 %v1773_v10, %v501_v18  ;;  %vm470_vm4 = vmor %vm468_vm3, %vm469_vm2  ;;  %v494_v15 = vor.u32 1.1754944e-38, %v493_v6  ;;  %vm492_vm9 = vcmp.eq.f32.partialorder %v491_v12, 8.507059e+37  ;;  %vm508_vm10 = vweird.f32 %v1773_v10  ;;  %v3189_v12 = vld [vmem:[#allocation35_spill] sm:$0xff] }
 0x1ac   :  { %v465_v19 = vsub.f32 1.0, %v464_v3  ;;  %vm509_vm12 = vmor %vm507_vm11, %vm508_vm10 }
 0x1ad   :  { %v504_v22 = vsub.f32 1.0, %v503_v14 }
 0x1ae   :  { %v466_v20 = vmul.f32 %v1771_v11, %v465_v19  ;;  %v475_v19 = vor.u32 1.1754944e-38, %v474_v7  ;;  %v3186_v7 = vld [vmem:[#allocation32_spill] sm:$0xff] }
 0x1af   :  { %v1775_v13 = vpop.eup %1774  ;;  %v505_v17 = vmul.f32 %v1773_v10, %v504_v22  ;;  %v3190_v22 = vld [vmem:[#allocation36_spill] sm:$0xff] }
 0x1b0   :  { %v483_v16 = vmul.f32 %v1775_v13, %v481_v5  ;;  %v467_v8 = vadd.f32 %v1771_v11, %v466_v20  ;;  %vm488_vm5 = vweird.f32 %v1775_v13  ;;  %v511_v5 = vand.u32 2147483647, %v501_v18 }
 0x1b1   :  { %vm489_vm8 = vmor %vm487_vm6, %vm488_vm5 }
 0x1b2   :  { %v484_v2 = vsub.f32 1.0, %v483_v16  ;;  %v471_v23 = vsel %vm470_vm4, %v1771_v11, %v467_v8  ;;  %v1777_v16 = vpop.eup %1776  ;;  %v513_v8 = vand.u32 2147483648, %v501_v18  ;;  %vm512_vm13 = vcmp.eq.f32.partialorder %v511_v5, 8.507059e+37  ;;  %v3183_v18 = vld [vmem:[#allocation29_spill] sm:$0xff] }
 0x1b3   :  { %v476_v20 = vsel %vm473_vm7, %v475_v19, %v471_v23  ;;  %v3191_v19 = vld [vmem:[#allocation37_spill] sm:$0xff] }
 0x1b4   :  { %v485_v3 = vmul.f32 %v1775_v13, %v484_v2  ;;  %v518_v62 = vmul.f32 %v1777_v16, %v476_v20  ;;  %v506_v2 = vadd.f32 %v1773_v10, %v505_v17  ;;  %v514_v23 = vor.u32 1.1754944e-38, %v513_v8  ;;  %v3193_v20 = vld [vmem:[#allocation39_spill] sm:$0xff]  ;;  %v3194_v16 = vld [vmem:[#allocation40_spill] sm:$0xff] }
 0x1b6   :  { %v486_v21 = vadd.f32 %v1775_v13, %v485_v3  ;;  %v510_v6 = vsel %vm509_vm12, %v1773_v10, %v506_v2  ;;  %v3185_v10 = vld [vmem:[#allocation31_spill] sm:$0xff]  ;;  %v3188_v3 = vld [vmem:[#allocation34_spill] sm:$0xff] }
 0x1b8   :  { %v490_v1 = vsel %vm489_vm8, %v1775_v13, %v486_v21  ;;  %v515_v13 = vsel %vm512_vm13, %v514_v23, %v510_v6  ;;  %v3192_v21 = vld [vmem:[#allocation38_spill] sm:$0xff]  ;;  %v3195_v6 = vld [vmem:[#allocation43_spill] sm:$0xff] }
 0x1b9   :  { %v495_v0 = vsel %vm492_vm9, %v494_v15, %v490_v1  ;;  %v3182_v1 = vld [vmem:[#allocation28_spill] sm:$0xff]  ;;  %v3184_v15 = vld [vmem:[#allocation30_spill] sm:$0xff] }
 0x1ba   :  { %v517_v63 = vmul.f32 0.0, %v495_v0  ;;  %v3181_v0 = vld [vmem:[#allocation27_spill] sm:$0xff] }
 0x1bc   :  { %v2497_v9 = vadd.f32 %v518_v62, %v517_v63  ;;  %v3179_v62 = vld [vmem:[#allocation25_spill] sm:$0xff]  ;;  %v3180_v63 = vld [vmem:[#allocation26_spill] sm:$0xff] }
 0x1be   :  { %1778 = vtanh.f32 %v2497_v9 }
 0x1c4   :  { %v1779_v11 = vpop.eup %1778 }
 0x1c5   :  { %v521_v14 = vmul.f32 %v1779_v11, %v515_v13  ;;  %v3196_v11 = vld [vmem:[#allocation45_spill] sm:$0xff] }
 0x1c7   :  { %538 = vmatmul.f32.vlgmr.msra.gmra.mxu1 %v521_v14  ;;  %558 = vmatmul.f32.vlgmr.msra.gmra.mxu2 %v521_v14 }
 0x1c8   :  { %578 = vmatmul.f32.vlgmr.msra.gmra.mxu3 %v521_v14  ;;  %598 = vmatmul.f32.vlgmr.msrb.gmra.mxu0 %v521_v14 }
 0x1c9   :  { %852 = vmatpush.msra.mxu1 %v2154_v24  ;;  %872 = vmatpush.msra.mxu2 %v2156_v25  ;;  %v3169_v24 = vld [vmem:[#allocation15_spill] sm:$0xff]  ;;  %v3170_v25 = vld [vmem:[#allocation16_spill] sm:$0xff] }
 0x1ca   :  { %892 = vmatpush.msra.mxu3 %v2158_v26  ;;  %912 = vmatpush.msrb.mxu0 %v2160_v27  ;;  %v3171_v26 = vld [vmem:[#allocation17_spill] sm:$0xff]  ;;  %v3172_v27 = vld [vmem:[#allocation18_spill] sm:$0xff] }
 0x1cb   :  { %853 = vmatpush.msra.mxu1 %v2162_v28  ;;  %873 = vmatpush.msra.mxu2 %v2164_v29  ;;  %v3173_v28 = vld [vmem:[#allocation19_spill] sm:$0xff]  ;;  %v3174_v29 = vld [vmem:[#allocation20_spill] sm:$0xff] }
 0x1cc   :  { %893 = vmatpush.msra.mxu3 %v2168_v30  ;;  %913 = vmatpush.msrb.mxu0 %v2170_v31  ;;  %v3175_v30 = vld [vmem:[#allocation21_spill] sm:$0xff]  ;;  %v3176_v31 = vld [vmem:[#allocation22_spill] sm:$0xff] }
 0x1cd   :  { %854 = vmatpush.msra.mxu1 %v2174_v32  ;;  %874 = vmatpush.msra.mxu2 %v2176_v33  ;;  %v3177_v32 = vld [vmem:[#allocation23_spill] sm:$0xff]  ;;  %v3178_v33 = vld [vmem:[#allocation24_spill] sm:$0xff] }
 0x1ce   :  { %894 = vmatpush.msra.mxu3 %v2180_v34  ;;  %914 = vmatpush.msrb.mxu0 %v2182_v35 }
 0x1cf   :  { %855 = vmatpush.msra.mxu1 %v2186_v36  ;;  %875 = vmatpush.msra.mxu2 %v2188_v37 }
 0x1d0   :  { %895 = vmatpush.msra.mxu3 %v2192_v38  ;;  %915 = vmatpush.msrb.mxu0 %v2194_v39 }
 0x1d1   :  { %856 = vmatpush.msra.mxu1 %v2198_v40  ;;  %876 = vmatpush.msra.mxu2 %v2200_v41 }
 0x1d2   :  { %896 = vmatpush.msra.mxu3 %v2204_v42  ;;  %916 = vmatpush.msrb.mxu0 %v2206_v43 }
 0x1d3   :  { %857 = vmatpush.msra.mxu1 %v2210_v44  ;;  %877 = vmatpush.msra.mxu2 %v2212_v45 }
 0x1d4   :  { %897 = vmatpush.msra.mxu3 %v2216_v46  ;;  %917 = vmatpush.msrb.mxu0 %v2218_v47 }
 0x1d5   :  { %858 = vmatpush.msra.mxu1 %v2222_v48  ;;  %878 = vmatpush.msra.mxu2 %v2224_v49 }
 0x1d6   :  { %898 = vmatpush.msra.mxu3 %v2228_v50  ;;  %918 = vmatpush.msrb.mxu0 %v2230_v51 }
 0x1d7   :  { %859 = vmatpush.msra.mxu1 %v2238_v52  ;;  %879 = vmatpush.msra.mxu2 %v2240_v53 }
 0x1d8   :  { %899 = vmatpush.msra.mxu3 %v2242_v54  ;;  %919 = vmatpush.msrb.mxu0 %v2246_v55 }
 0x1d9   :  { %860 = vmatpush.msra.mxu1 %v2250_v56  ;;  %880 = vmatpush.msra.mxu2 %v2252_v57 }
 0x1da   :  { %900 = vmatpush.msra.mxu3 %v2254_v58  ;;  %920 = vmatpush.msrb.mxu0 %v2258_v59 }
 0x1db   :  { %861 = vmatpush.msra.mxu1 %v2260_v60  ;;  %881 = vmatpush.msra.mxu2 %v2262_v61 }
 0x1dc   :  { %901 = vmatpush.msra.mxu3 %v3169_v24  ;;  %921 = vmatpush.msrb.mxu0 %v3170_v25 }
 0x1dd   :  { %862 = vmatpush.msra.mxu1 %v3171_v26  ;;  %882 = vmatpush.msra.mxu2 %v3172_v27 }
 0x1de   :  { %902 = vmatpush.msra.mxu3 %v3173_v28  ;;  %922 = vmatpush.msrb.mxu0 %v3174_v29 }
 0x1df   :  { %863 = vmatpush.msra.mxu1 %v3175_v30  ;;  %883 = vmatpush.msra.mxu2 %v3176_v31 }
 0x1e0   :  { %903 = vmatpush.msra.mxu3 %v3177_v32  ;;  %923 = vmatpush.msrb.mxu0 %v3178_v33 }
 0x1e1   :  { %864 = vmatpush.msra.mxu1 %v3179_v62  ;;  %884 = vmatpush.msra.mxu2 %v3180_v63 }
 0x1e2   :  { %904 = vmatpush.msra.mxu3 %v3181_v0  ;;  %924 = vmatpush.msrb.mxu0 %v3182_v1  ;;  %v677_v0 = vrot.slane %v2497_v9, 6 }
 0x1e3   :  { %865 = vmatpush.msra.mxu1 %v3183_v18  ;;  %885 = vmatpush.msra.mxu2 %v3184_v15 }
 0x1e4   :  { %905 = vmatpush.msra.mxu3 %v3185_v10  ;;  %925 = vmatpush.msrb.mxu0 %v3186_v7 }
 0x1e5   :  { %866 = vmatpush.msra.mxu1 %v3187_v4  ;;  %886 = vmatpush.msra.mxu2 %v3188_v3 }
 0x1e6   :  { %906 = vmatpush.msra.mxu3 %v3189_v12  ;;  %926 = vmatpush.msrb.mxu0 %v3190_v22 }
 0x1e7   :  { %867 = vmatpush.msra.mxu1 %v3191_v19  ;;  %887 = vmatpush.msra.mxu2 %v3192_v21  ;;  %v3197_v19 = vld [vmem:[#allocation47_spill] sm:$0xff] }
 0x1e8   :  { %907 = vmatpush.msra.mxu3 %v3193_v20  ;;  %927 = vmatpush.msrb.mxu0 %v3194_v16 }
 0x244   :  { %v539_v17 = vpop.f32.mrf.mxu1 }
 0x245   :  { %v606_v2 = vrot.slane %v539_v17, 6  ;;  %v599_v8 = vpop.f32.mrf.mxu0 }
 0x246   :  { %v609_v5 = vrot.slane %v599_v8, 6 }
 0x247   :  { %v614_v23 = vadd.f32 %v606_v2, %v3195_v6 }
 0x248   :  { %v617_v13 = vadd.f32 %v609_v5, %v3196_v11 }
 0x249   :  { %v1729_v14 = vmul.f32 -1.442695, %v614_v23 }
 0x24a   :  { %v1731_v12 = vmul.f32 -1.442695, %v617_v13  ;;  %v559_v3 = vpop.f32.mrf.mxu2 }
 0x24b   :  { %1780 = vpow2.f32 %v1729_v14  ;;  %v607_v22 = vrot.slane %v559_v3, 6  ;;  %v579_v2 = vpop.f32.mrf.mxu3 }
 0x24c   :  { %1782 = vpow2.f32 %v1731_v12  ;;  %v608_v13 = vrot.slane %v579_v2, 6 }
 0x24d   :  { %v615_v21 = vadd.f32 %v607_v22, %v3197_v19  ;;  %v3198_v22 = vld [vmem:[#allocation48_spill] sm:$0xff] }
 0x24f   :  { %v1730_v4 = vmul.f32 -1.442695, %v615_v21  ;;  %v616_v21 = vadd.f32 %v608_v13, %v3198_v22 }
 0x251   :  { %v1781_v20 = vpop.eup %1780  ;;  %1784 = vpow2.f32 %v1730_v4 }
 0x252   :  { %v1783_v16 = vpop.eup %1782  ;;  %v621_v7 = vadd.f32 1.0, %v1781_v20 }
 0x253   :  { %v660_v17 = vadd.f32 1.0, %v1783_v16 }
 0x254   :  { %1786 = vrcp.f32 %v621_v7  ;;  %v633_v6 = vand.u32 2147483648, %v621_v7  ;;  %vm627_vm15 = vweird.f32 %v621_v7 }
 0x255   :  { %1788 = vrcp.f32 %v660_v17  ;;  %vm666_vm7 = vweird.f32 %v660_v17 }
 0x257   :  { %v1785_v8 = vpop.eup %1784 }
 0x258   :  { %v640_v10 = vadd.f32 1.0, %v1785_v8  ;;  %v631_v8 = vand.u32 2147483647, %v621_v7 }
 0x25a   :  { %v1787_v5 = vpop.eup %1786  ;;  %1790 = vrcp.f32 %v640_v10  ;;  %v652_v15 = vand.u32 2147483648, %v640_v10  ;;  %vm646_vm2 = vweird.f32 %v640_v10  ;;  %vm632_vm3 = vcmp.eq.f32.partialorder %v631_v8, 8.507059e+37  ;;  %v2593_v8 = vld [vmem:[#allocation7 + $0x1d8] sm:$0xff] }
 0x25b   :  { %v623_v23 = vmul.f32 %v1787_v5, %v621_v7  ;;  %v1789_v3 = vpop.eup %1788  ;;  %vm628_vm14 = vweird.f32 %v1787_v5  ;;  %1792 = vtanh.f32 %v616_v21 }
 0x25c   :  { %v662_v20 = vmul.f32 %v1789_v3, %v660_v17  ;;  %vm629_vm0 = vmor %vm627_vm15, %vm628_vm14  ;;  %vm667_vm6 = vweird.f32 %v1789_v3 }
 0x25d   :  { %v624_v14 = vsub.f32 1.0, %v623_v23  ;;  %v650_v23 = vand.u32 2147483647, %v640_v10  ;;  %vm668_vm8 = vmor %vm666_vm7, %vm667_vm6 }
 0x25e   :  { %v663_v1 = vsub.f32 1.0, %v662_v20 }
 0x25f   :  { %v625_v12 = vmul.f32 %v1787_v5, %v624_v14  ;;  %v634_v14 = vor.u32 1.1754944e-38, %v633_v6  ;;  %vm651_vm5 = vcmp.eq.f32.partialorder %v650_v23, 8.507059e+37  ;;  %v2599_v23 = vld [vmem:[#allocation7 + $0x1a8] sm:$0xff] }
 0x260   :  { %v1791_v11 = vpop.eup %1790  ;;  %v664_v62 = vmul.f32 %v1789_v3, %v663_v1  ;;  %v2581_v1 = vld [vmem:[#allocation7 + $0x1f8] sm:$0xff] }
 0x261   :  { %v642_v19 = vmul.f32 %v1791_v11, %v640_v10  ;;  %v626_v4 = vadd.f32 %v1787_v5, %v625_v12  ;;  %vm647_vm1 = vweird.f32 %v1791_v11  ;;  %v653_v12 = vor.u32 1.1754944e-38, %v652_v15  ;;  %v1793_v7 = vpop.eup %1792 }
 0x262   :  { %vm648_vm4 = vmor %vm646_vm2, %vm647_vm1  ;;  %v672_v10 = vand.u32 2147483648, %v660_v17 }
 0x263   :  { %v643_v16 = vsub.f32 1.0, %v642_v19  ;;  %v630_v2 = vsel %vm629_vm0, %v1787_v5, %v626_v4  ;;  %v665_v5 = vadd.f32 %v1789_v3, %v664_v62  ;;  %v2575_v62 = vld [vmem:[#allocation7 + $0x1e8] sm:$0xff] }
 0x264   :  { %v635_v22 = vsel %vm632_vm3, %v634_v14, %v630_v2  ;;  %v673_v6 = vor.u32 1.1754944e-38, %v672_v10  ;;  %v2596_v2 = vld [vmem:[#allocation7 + $0x1a0] sm:$0xff] }
 0x265   :  { %v644_v18 = vmul.f32 %v1791_v11, %v643_v16  ;;  %v680_v16 = vmul.f32 %v1793_v7, %v635_v22  ;;  %v669_v15 = vsel %vm668_vm8, %v1789_v3, %v665_v5  ;;  %v2587_v3 = vld [vmem:[#allocation7 + $0x1c8] sm:$0xff]  ;;  %v2590_v22 = vld [vmem:[#allocation7 + $0x1d0] sm:$0xff] }
 0x267   :  { %v645_v13 = vadd.f32 %v1791_v11, %v644_v18  ;;  %v670_v18 = vand.u32 2147483647, %v660_v17  ;;  %v2584_v17 = vld [vmem:[#allocation7 + $0x1c0] sm:$0xff] }
 0x269   :  { %v649_v19 = vsel %vm648_vm4, %v1791_v11, %v645_v13  ;;  %vm671_vm9 = vcmp.eq.f32.partialorder %v670_v18, 8.507059e+37  ;;  %v3219_v18 = vld [vmem:[#allocation48_spill] sm:$0xff] }
 0x26a   :  { %v654_v63 = vsel %vm651_vm5, %v653_v12, %v649_v19  ;;  %v674_v11 = vsel %vm671_vm9, %v673_v6, %v669_v15 }
 0x26b   :  { %v679_v21 = vmul.f32 %v677_v0, %v654_v63  ;;  %v2572_v63 = vld [vmem:[#allocation7 + $0x1e0] sm:$0xff]  ;;  %v2578_v0 = vld [vmem:[#allocation7 + $0x1f0] sm:$0xff] }
 0x26d   :  { %v2569_v33 = vadd.f32 %v680_v16, %v679_v21 }
 0x26f   :  { %1794 = vtanh.f32 %v2569_v33 }
 0x275   :  { %v1795_v9 = vpop.eup %1794 }
 0x276   :  { %v683_v4 = vmul.f32 %v1795_v9, %v674_v11 }
 0x278   :  { %v685_v20 = vrot.slane %v683_v4, 2 }
 0x27a   :  { %703 = vmatmul.f32.vlgmr.msrb.gmra.mxu1 %v685_v20  ;;  %723 = vmatmul.f32.vlgmr.msrb.gmra.mxu2 %v685_v20 }
 0x27b   :  { %743 = vmatmul.f32.vlgmr.msrb.gmra.mxu3 %v685_v20  ;;  %763 = vmatmul.f32.vlgmr.msra.gmra.mxu0 %v685_v20 }
 0x27c   :  { %1017 = vmatpush.msrb.mxu1 %v2572_v63  ;;  %1037 = vmatpush.msrb.mxu2 %v2575_v62 }
 0x27d   :  { %1057 = vmatpush.msrb.mxu3 %v2578_v0  ;;  %1077 = vmatpush.msra.mxu0 %v2581_v1 }
 0x27e   :  { %1018 = vmatpush.msrb.mxu1 %v2584_v17  ;;  %1038 = vmatpush.msrb.mxu2 %v2587_v3 }
 0x27f   :  { %1058 = vmatpush.msrb.mxu3 %v2590_v22  ;;  %1078 = vmatpush.msra.mxu0 %v2593_v8 }
 0x280   :  { %1019 = vmatpush.msrb.mxu1 %v2596_v2  ;;  %1039 = vmatpush.msrb.mxu2 %v2599_v23 }
 0x281   :  { %1059 = vmatpush.msrb.mxu3 %v2180_v34  ;;  %1079 = vmatpush.msra.mxu0 %v2182_v35  ;;  %v3199_v34 = vld [vmem:[#allocation24_spill] sm:$0xff]  ;;  %v3200_v35 = vld [vmem:[#allocation25_spill] sm:$0xff] }
 0x282   :  { %1020 = vmatpush.msrb.mxu1 %v2186_v36  ;;  %1040 = vmatpush.msrb.mxu2 %v2188_v37  ;;  %v3201_v36 = vld [vmem:[#allocation26_spill] sm:$0xff]  ;;  %v3202_v37 = vld [vmem:[#allocation27_spill] sm:$0xff] }
 0x283   :  { %1060 = vmatpush.msrb.mxu3 %v2192_v38  ;;  %1080 = vmatpush.msra.mxu0 %v2194_v39  ;;  %v3203_v38 = vld [vmem:[#allocation28_spill] sm:$0xff]  ;;  %v3204_v39 = vld [vmem:[#allocation29_spill] sm:$0xff] }
 0x284   :  { %1021 = vmatpush.msrb.mxu1 %v2198_v40  ;;  %1041 = vmatpush.msrb.mxu2 %v2200_v41  ;;  %v3205_v40 = vld [vmem:[#allocation30_spill] sm:$0xff]  ;;  %v3206_v41 = vld [vmem:[#allocation31_spill] sm:$0xff] }
 0x285   :  { %1061 = vmatpush.msrb.mxu3 %v2204_v42  ;;  %1081 = vmatpush.msra.mxu0 %v2206_v43  ;;  %v3207_v42 = vld [vmem:[#allocation32_spill] sm:$0xff]  ;;  %v3208_v43 = vld [vmem:[#allocation33_spill] sm:$0xff] }
 0x286   :  { %1022 = vmatpush.msrb.mxu1 %v2210_v44  ;;  %1042 = vmatpush.msrb.mxu2 %v2212_v45  ;;  %v3209_v44 = vld [vmem:[#allocation34_spill] sm:$0xff]  ;;  %v3210_v45 = vld [vmem:[#allocation35_spill] sm:$0xff] }
 0x287   :  { %1062 = vmatpush.msrb.mxu3 %v2216_v46  ;;  %1082 = vmatpush.msra.mxu0 %v2218_v47  ;;  %v3211_v46 = vld [vmem:[#allocation36_spill] sm:$0xff]  ;;  %v3212_v47 = vld [vmem:[#allocation37_spill] sm:$0xff] }
 0x288   :  { %1023 = vmatpush.msrb.mxu1 %v2222_v48  ;;  %1043 = vmatpush.msrb.mxu2 %v2224_v49  ;;  %v3213_v48 = vld [vmem:[#allocation38_spill] sm:$0xff]  ;;  %v3214_v49 = vld [vmem:[#allocation39_spill] sm:$0xff] }
 0x289   :  { %1063 = vmatpush.msrb.mxu3 %v2228_v50  ;;  %1083 = vmatpush.msra.mxu0 %v2230_v51  ;;  %v3215_v50 = vld [vmem:[#allocation40_spill] sm:$0xff] }
 0x28a   :  { %1024 = vmatpush.msrb.mxu1 %v2238_v52  ;;  %1044 = vmatpush.msrb.mxu2 %v2240_v53 }
 0x28b   :  { %1064 = vmatpush.msrb.mxu3 %v2242_v54  ;;  %1084 = vmatpush.msra.mxu0 %v2246_v55  ;;  %v3216_v55 = vld [vmem:[#allocation43_spill] sm:$0xff] }
 0x28c   :  { %1025 = vmatpush.msrb.mxu1 %v2250_v56  ;;  %1045 = vmatpush.msrb.mxu2 %v2252_v57  ;;  %v3217_v57 = vld [vmem:[#allocation45_spill] sm:$0xff] }
 0x28d   :  { %1065 = vmatpush.msrb.mxu3 %v2254_v58  ;;  %1085 = vmatpush.msra.mxu0 %v2258_v59 }
 0x28e   :  { %1026 = vmatpush.msrb.mxu1 %v2260_v60  ;;  %1046 = vmatpush.msrb.mxu2 %v2262_v61 }
 0x28f   :  { %1066 = vmatpush.msrb.mxu3 %v3169_v24  ;;  %1086 = vmatpush.msra.mxu0 %v3170_v25  ;;  %v3218_v25 = vld [vmem:[#allocation47_spill] sm:$0xff] }
 0x290   :  { %1027 = vmatpush.msrb.mxu1 %v3171_v26  ;;  %1047 = vmatpush.msrb.mxu2 %v3172_v27 }
 0x291   :  { %1067 = vmatpush.msrb.mxu3 %v3173_v28  ;;  %1087 = vmatpush.msra.mxu0 %v3174_v29 }
 0x292   :  { %1028 = vmatpush.msrb.mxu1 %v3175_v30  ;;  %1048 = vmatpush.msrb.mxu2 %v3176_v31 }
 0x293   :  { %1068 = vmatpush.msrb.mxu3 %v3177_v32  ;;  %1088 = vmatpush.msra.mxu0 %v3199_v34 }
 0x294   :  { %1029 = vmatpush.msrb.mxu1 %v3200_v35  ;;  %1049 = vmatpush.msrb.mxu2 %v3201_v36 }
 0x295   :  { %1069 = vmatpush.msrb.mxu3 %v3202_v37  ;;  %1089 = vmatpush.msra.mxu0 %v3203_v38 }
 0x296   :  { %1030 = vmatpush.msrb.mxu1 %v3204_v39  ;;  %1050 = vmatpush.msrb.mxu2 %v3205_v40 }
 0x297   :  { %1070 = vmatpush.msrb.mxu3 %v3206_v41  ;;  %1090 = vmatpush.msra.mxu0 %v3207_v42 }
 0x298   :  { %1031 = vmatpush.msrb.mxu1 %v3208_v43  ;;  %1051 = vmatpush.msrb.mxu2 %v3209_v44  ;;  %v842_v44 = vrot.slane %v2569_v33, 6 }
 0x299   :  { %1071 = vmatpush.msrb.mxu3 %v3210_v45  ;;  %1091 = vmatpush.msra.mxu0 %v3211_v46 }
 0x29a   :  { %1032 = vmatpush.msrb.mxu1 %v3212_v47  ;;  %1052 = vmatpush.msrb.mxu2 %v3213_v48 }
 0x29b   :  { %1072 = vmatpush.msrb.mxu3 %v3214_v49  ;;  %1092 = vmatpush.msra.mxu0 %v3215_v50 }
 0x2f7   :  { %v704_v51 = vpop.f32.mrf.mxu1 }
 0x2f8   :  { %v771_v52 = vrot.slane %v704_v51, 4  ;;  %v764_v53 = vpop.f32.mrf.mxu0 }
 0x2f9   :  { %v774_v54 = vrot.slane %v764_v53, 4 }
 0x2fa   :  { %v779_v56 = vadd.f32 %v771_v52, %v3216_v55 }
 0x2fb   :  { %v782_v58 = vadd.f32 %v774_v54, %v3217_v57 }
 0x2fc   :  { %v1732_v59 = vmul.f32 -1.442695, %v779_v56 }
 0x2fd   :  { %v1734_v60 = vmul.f32 -1.442695, %v782_v58  ;;  %v724_v61 = vpop.f32.mrf.mxu2 }
 0x2fe   :  { %1796 = vpow2.f32 %v1732_v59  ;;  %v772_v24 = vrot.slane %v724_v61, 4  ;;  %v744_v13 = vpop.f32.mrf.mxu3 }
 0x2ff   :  { %1798 = vpow2.f32 %v1734_v60  ;;  %v773_v7 = vrot.slane %v744_v13, 4  ;;  %v2701_v13 = vld [vmem:[#allocation7 + $0x178] sm:$0xff] }
 0x300   :  { %v780_v26 = vadd.f32 %v772_v24, %v3218_v25  ;;  %v2674_v24 = vld [vmem:[#allocation7 + $0x1b0] sm:$0xff] }
 0x301   :  { %v781_v15 = vadd.f32 %v773_v7, %v3219_v18  ;;  %v2710_v7 = vld [vmem:[#allocation7 + $0x150] sm:$0xff] }
 0x302   :  { %v1733_v27 = vmul.f32 -1.442695, %v780_v26  ;;  %v2677_v26 = vld [vmem:[#allocation7 + $0x1b8] sm:$0xff] }
 0x304   :  { %v1797_v28 = vpop.eup %1796  ;;  %1800 = vpow2.f32 %v1733_v27  ;;  %v2680_v27 = vld [vmem:[#allocation7 + $0x180] sm:$0xff] }
 0x305   :  { %v1799_v29 = vpop.eup %1798  ;;  %v786_v30 = vadd.f32 1.0, %v1797_v28  ;;  %v2683_v28 = vld [vmem:[#allocation7 + $0x188] sm:$0xff] }
 0x306   :  { %v825_v31 = vadd.f32 1.0, %v1799_v29  ;;  %v2686_v29 = vld [vmem:[#allocation7 + $0x190] sm:$0xff] }
 0x307   :  { %1802 = vrcp.f32 %v786_v30  ;;  %v798_v4 = vand.u32 2147483648, %v786_v30  ;;  %vm792_vm11 = vweird.f32 %v786_v30  ;;  %v796_v34 = vand.u32 2147483647, %v786_v30 }
 0x308   :  { %1804 = vrcp.f32 %v825_v31  ;;  %v837_v53 = vand.u32 2147483648, %v825_v31  ;;  %vm831_vm3 = vweird.f32 %v825_v31  ;;  %v835_v54 = vand.u32 2147483647, %v825_v31 }
 0x309   :  { %v799_v40 = vor.u32 1.1754944e-38, %v798_v4  ;;  %vm797_vm15 = vcmp.eq.f32.partialorder %v796_v34, 8.507059e+37  ;;  %v2737_v4 = vld [vmem:[#allocation7 + $0x118] sm:$0xff]  ;;  %v2743_v34 = vld [vmem:[#allocation7 + $0xe8] sm:$0xff] }
 0x30a   :  { %v1801_v32 = vpop.eup %1800  ;;  %v838_v58 = vor.u32 1.1754944e-38, %v837_v53  ;;  %vm836_vm5 = vcmp.eq.f32.partialorder %v835_v54, 8.507059e+37  ;;  %v2797_v53 = vld [vmem:[#allocation7 + $0x78] sm:$0xff]  ;;  %v2800_v54 = vld [vmem:[#allocation7 + $0x40] sm:$0xff] }
 0x30b   :  { %v805_v14 = vadd.f32 1.0, %v1801_v32  ;;  %v2695_v32 = vld [vmem:[#allocation7 + $0x168] sm:$0xff]  ;;  %3234 = vst [vmem:[#allocation29_spill] sm:$0xff] %v2797_v53 }
 0x30c   :  { %3235 = vst [vmem:[#allocation30_spill] sm:$0xff] %v2800_v54 }
 0x30d   :  { %v1803_v12 = vpop.eup %1802  ;;  %1806 = vrcp.f32 %v805_v14  ;;  %v817_v35 = vand.u32 2147483648, %v805_v14  ;;  %v815_v38 = vand.u32 2147483647, %v805_v14  ;;  %vm811_vm14 = vweird.f32 %v805_v14 }
 0x30e   :  { %v788_v19 = vmul.f32 %v1803_v12, %v786_v30  ;;  %v1805_v16 = vpop.eup %1804  ;;  %vm793_vm10 = vweird.f32 %v1803_v12  ;;  %1808 = vtanh.f32 %v781_v15  ;;  %v2689_v30 = vld [vmem:[#allocation7 + $0x198] sm:$0xff] }
 0x30f   :  { %v827_v11 = vmul.f32 %v1805_v16, %v825_v31  ;;  %vm794_vm12 = vmor %vm792_vm11, %vm793_vm10  ;;  %v818_v42 = vor.u32 1.1754944e-38, %v817_v35  ;;  %vm816_vm1 = vcmp.eq.f32.partialorder %v815_v38, 8.507059e+37  ;;  %vm832_vm2 = vweird.f32 %v1805_v16  ;;  %v2692_v31 = vld [vmem:[#allocation7 + $0x160] sm:$0xff]  ;;  %v2725_v15 = vld [vmem:[#allocation7 + $0x138] sm:$0xff] }
 0x310   :  { %v789_v21 = vsub.f32 1.0, %v788_v19  ;;  %vm833_vm4 = vmor %vm831_vm3, %vm832_vm2  ;;  %v2707_v19 = vld [vmem:[#allocation7 + $0x148] sm:$0xff]  ;;  %v2746_v35 = vld [vmem:[#allocation7 + $0xf0] sm:$0xff] }
 0x311   :  { %v828_v39 = vsub.f32 1.0, %v827_v11  ;;  %v2734_v11 = vld [vmem:[#allocation7 + $0x110] sm:$0xff]  ;;  %v2755_v38 = vld [vmem:[#allocation7 + $0xc8] sm:$0xff] }
 0x312   :  { %v790_v5 = vmul.f32 %v1803_v12, %v789_v21  ;;  %v2713_v21 = vld [vmem:[#allocation7 + $0x158] sm:$0xff]  ;;  %3220 = vst [vmem:[#allocation15_spill] sm:$0xff] %v2755_v38 }
 0x313   :  { %v1807_v10 = vpop.eup %1806  ;;  %v829_v48 = vmul.f32 %v1805_v16, %v828_v39  ;;  %v2758_v39 = vld [vmem:[#allocation7 + $0xd0] sm:$0xff] }
 0x314   :  { %v807_v6 = vmul.f32 %v1807_v10, %v805_v14  ;;  %v791_v9 = vadd.f32 %v1803_v12, %v790_v5  ;;  %vm812_vm13 = vweird.f32 %v1807_v10  ;;  %v1809_v46 = vpop.eup %1808  ;;  %v2698_v14 = vld [vmem:[#allocation7 + $0x170] sm:$0xff]  ;;  %v2719_v5 = vld [vmem:[#allocation7 + $0x128] sm:$0xff]  ;;  %3221 = vst [vmem:[#allocation16_spill] sm:$0xff] %v2758_v39 }
 0x315   :  { %vm813_vm0 = vmor %vm811_vm14, %vm812_vm13  ;;  %v830_v52 = vadd.f32 %v1805_v16, %v829_v48  ;;  %v2785_v48 = vld [vmem:[#allocation7 + $0x98] sm:$0xff] }
 0x316   :  { %v808_v20 = vsub.f32 1.0, %v807_v6  ;;  %v795_v37 = vsel %vm794_vm12, %v1803_v12, %v791_v9  ;;  %v2704_v12 = vld [vmem:[#allocation7 + $0x140] sm:$0xff]  ;;  %v2731_v9 = vld [vmem:[#allocation7 + $0x108] sm:$0xff]  ;;  %3230 = vst [vmem:[#allocation25_spill] sm:$0xff] %v2785_v48 }
 0x317   :  { %v800_v43 = vsel %vm797_vm15, %v799_v40, %v795_v37  ;;  %v834_v56 = vsel %vm833_vm4, %v1805_v16, %v830_v52  ;;  %v2716_v16 = vld [vmem:[#allocation7 + $0x120] sm:$0xff]  ;;  %v2761_v40 = vld [vmem:[#allocation7 + $0xd8] sm:$0xff]  ;;  %v2794_v52 = vld [vmem:[#allocation7 + $0x70] sm:$0xff] }
 0x318   :  { %v809_v36 = vmul.f32 %v1807_v10, %v808_v20  ;;  %v845_v50 = vmul.f32 %v1809_v46, %v800_v43  ;;  %v839_v59 = vsel %vm836_vm5, %v838_v58, %v834_v56  ;;  %v2728_v6 = vld [vmem:[#allocation7 + $0x100] sm:$0xff]  ;;  %3222 = vst [vmem:[#allocation17_spill] sm:$0xff] %v2761_v40  ;;  %v2770_v43 = vld [vmem:[#allocation7 + $0xb0] sm:$0xff]  ;;  %v2779_v46 = vld [vmem:[#allocation7 + $0x88] sm:$0xff] }
 0x319   :  { %v2740_v20 = vld [vmem:[#allocation7 + $0xe0] sm:$0xff]  ;;  %3225 = vst [vmem:[#allocation20_spill] sm:$0xff] %v2770_v43  ;;  %v2803_v56 = vld [vmem:[#allocation7 + $0x48] sm:$0xff]  ;;  %v2806_v58 = vld [vmem:[#allocation7 + $0x50] sm:$0xff] }
 0x31a   :  { %v810_v41 = vadd.f32 %v1807_v10, %v809_v36  ;;  %v2749_v36 = vld [vmem:[#allocation7 + $0xf8] sm:$0xff]  ;;  %v2752_v37 = vld [vmem:[#allocation7 + $0xc0] sm:$0xff]  ;;  %3228 = vst [vmem:[#allocation23_spill] sm:$0xff] %v2779_v46 }
 0x31b   :  { %3233 = vst [vmem:[#allocation28_spill] sm:$0xff] %v2794_v52 }
 0x31c   :  { %v814_v45 = vsel %vm813_vm0, %v1807_v10, %v810_v41  ;;  %v2722_v10 = vld [vmem:[#allocation7 + $0x130] sm:$0xff]  ;;  %v2764_v41 = vld [vmem:[#allocation7 + $0xa0] sm:$0xff]  ;;  %3236 = vst [vmem:[#allocation31_spill] sm:$0xff] %v2803_v56 }
 0x31d   :  { %v819_v47 = vsel %vm816_vm1, %v818_v42, %v814_v45  ;;  %3223 = vst [vmem:[#allocation18_spill] sm:$0xff] %v2764_v41  ;;  %v2767_v42 = vld [vmem:[#allocation7 + $0xa8] sm:$0xff]  ;;  %v2776_v45 = vld [vmem:[#allocation7 + $0x80] sm:$0xff] }
 0x31e   :  { %v844_v49 = vmul.f32 %v842_v44, %v819_v47  ;;  %3224 = vst [vmem:[#allocation19_spill] sm:$0xff] %v2767_v42  ;;  %v2773_v44 = vld [vmem:[#allocation7 + $0xb8] sm:$0xff]  ;;  %v2782_v47 = vld [vmem:[#allocation7 + $0x90] sm:$0xff] }
 0x31f   :  { %3226 = vst [vmem:[#allocation21_spill] sm:$0xff] %v2773_v44 }
 0x320   :  { %v2661_v51 = vadd.f32 %v845_v50, %v844_v49  ;;  %3227 = vst [vmem:[#allocation22_spill] sm:$0xff] %v2776_v45  ;;  %v2788_v49 = vld [vmem:[#allocation7 + $0x60] sm:$0xff]  ;;  %v2791_v50 = vld [vmem:[#allocation7 + $0x68] sm:$0xff] }
 0x321   :  { %3229 = vst [vmem:[#allocation24_spill] sm:$0xff] %v2782_v47 }
 0x322   :  { %1810 = vtanh.f32 %v2661_v51  ;;  %3231 = vst [vmem:[#allocation26_spill] sm:$0xff] %v2788_v49 }
 0x323   :  { %3232 = vst [vmem:[#allocation27_spill] sm:$0xff] %v2791_v50 }
 0x324   :  { %3237 = vst [vmem:[#allocation32_spill] sm:$0xff] %v2806_v58 }
 0x328   :  { %v1811_v33 = vpop.eup %1810 }
 0x329   :  { %v848_v60 = vmul.f32 %v1811_v33, %v839_v59  ;;  %v2809_v33 = vld [vmem:[#allocation7 + $0x58] sm:$0xff]  ;;  %v2812_v59 = vld [vmem:[#allocation7 + $0x20] sm:$0xff] }
 0x32a   :  { %3238 = vst [vmem:[#allocation33_spill] sm:$0xff] %v2809_v33 }
 0x32b   :  { %v850_v61 = vrot.slane %v848_v60, 4  ;;  %3239 = vst [vmem:[#allocation34_spill] sm:$0xff] %v2812_v59  ;;  %v2815_v60 = vld [vmem:[#allocation7 + $0x28] sm:$0xff] }
 0x32c   :  { %3240 = vst [vmem:[#allocation35_spill] sm:$0xff] %v2815_v60 }
 0x32d   :  { %868 = vmatmul.f32.vlgmr.msra.gmra.mxu1 %v850_v61  ;;  %888 = vmatmul.f32.vlgmr.msra.gmra.mxu2 %v850_v61 }
 0x32e   :  { %908 = vmatmul.f32.vlgmr.msra.gmra.mxu3 %v850_v61  ;;  %928 = vmatmul.f32.vlgmr.msrb.gmra.mxu0 %v850_v61  ;;  %v2818_v61 = vld [vmem:[#allocation7 + $0x30] sm:$0xff] }
 0x32f   :  { %1167 = vmatpush.msra.mxu1 %v2572_v63  ;;  %1187 = vmatpush.msra.mxu2 %v2575_v62  ;;  %3241 = vst [vmem:[#allocation36_spill] sm:$0xff] %v2818_v61 }
 0x330   :  { %1207 = vmatpush.msra.mxu3 %v2578_v0  ;;  %1227 = vmatpush.msrb.mxu0 %v2581_v1 }
 0x331   :  { %1168 = vmatpush.msra.mxu1 %v2584_v17  ;;  %1188 = vmatpush.msra.mxu2 %v2587_v3 }
 0x332   :  { %1208 = vmatpush.msra.mxu3 %v2590_v22  ;;  %1228 = vmatpush.msrb.mxu0 %v2593_v8 }
 0x333   :  { %1169 = vmatpush.msra.mxu1 %v2596_v2  ;;  %1189 = vmatpush.msra.mxu2 %v2599_v23 }
 0x334   :  { %1209 = vmatpush.msra.mxu3 %v2674_v24  ;;  %1229 = vmatpush.msrb.mxu0 %v2677_v26 }
 0x335   :  { %1170 = vmatpush.msra.mxu1 %v2680_v27  ;;  %1190 = vmatpush.msra.mxu2 %v2683_v28 }
 0x336   :  { %1210 = vmatpush.msra.mxu3 %v2686_v29  ;;  %1230 = vmatpush.msrb.mxu0 %v2689_v30 }
 0x337   :  { %1171 = vmatpush.msra.mxu1 %v2692_v31  ;;  %1191 = vmatpush.msra.mxu2 %v2695_v32 }
 0x338   :  { %1211 = vmatpush.msra.mxu3 %v2698_v14  ;;  %1231 = vmatpush.msrb.mxu0 %v2701_v13 }
 0x339   :  { %1172 = vmatpush.msra.mxu1 %v2704_v12  ;;  %1192 = vmatpush.msra.mxu2 %v2707_v19 }
 0x33a   :  { %1212 = vmatpush.msra.mxu3 %v2710_v7  ;;  %1232 = vmatpush.msrb.mxu0 %v2713_v21 }
 0x33b   :  { %1173 = vmatpush.msra.mxu1 %v2716_v16  ;;  %1193 = vmatpush.msra.mxu2 %v2719_v5 }
 0x33c   :  { %1213 = vmatpush.msra.mxu3 %v2722_v10  ;;  %1233 = vmatpush.msrb.mxu0 %v2725_v15 }
 0x33d   :  { %1174 = vmatpush.msra.mxu1 %v2728_v6  ;;  %1194 = vmatpush.msra.mxu2 %v2731_v9 }
 0x33e   :  { %1214 = vmatpush.msra.mxu3 %v2734_v11  ;;  %1234 = vmatpush.msrb.mxu0 %v2737_v4 }
 0x33f   :  { %1175 = vmatpush.msra.mxu1 %v2740_v20  ;;  %1195 = vmatpush.msra.mxu2 %v2743_v34 }
 0x340   :  { %1215 = vmatpush.msra.mxu3 %v2746_v35  ;;  %1235 = vmatpush.msrb.mxu0 %v2749_v36 }
 0x341   :  { %1176 = vmatpush.msra.mxu1 %v2752_v37  ;;  %1196 = vmatpush.msra.mxu2 %v2755_v38 }
 0x342   :  { %1216 = vmatpush.msra.mxu3 %v2758_v39  ;;  %1236 = vmatpush.msrb.mxu0 %v2761_v40 }
 0x343   :  { %1177 = vmatpush.msra.mxu1 %v2764_v41  ;;  %1197 = vmatpush.msra.mxu2 %v2767_v42  ;;  %v1007_v41 = vrot.slane %v2661_v51, 6 }
 0x344   :  { %1217 = vmatpush.msra.mxu3 %v2770_v43  ;;  %1237 = vmatpush.msrb.mxu0 %v2773_v44 }
 0x345   :  { %1178 = vmatpush.msra.mxu1 %v2776_v45  ;;  %1198 = vmatpush.msra.mxu2 %v2779_v46 }
 0x346   :  { %1218 = vmatpush.msra.mxu3 %v2782_v47  ;;  %1238 = vmatpush.msrb.mxu0 %v2785_v48 }
 0x347   :  { %1179 = vmatpush.msra.mxu1 %v2788_v49  ;;  %1199 = vmatpush.msra.mxu2 %v2791_v50 }
 0x348   :  { %1219 = vmatpush.msra.mxu3 %v2794_v52  ;;  %1239 = vmatpush.msrb.mxu0 %v2797_v53 }
 0x349   :  { %1180 = vmatpush.msra.mxu1 %v2800_v54  ;;  %1200 = vmatpush.msra.mxu2 %v2803_v56  ;;  %v2821_v56 = vld [vmem:[#allocation7 + $0x38] sm:$0xff] }
 0x34a   :  { %1220 = vmatpush.msra.mxu3 %v2806_v58  ;;  %1240 = vmatpush.msrb.mxu0 %v2809_v33  ;;  %3242 = vst [vmem:[#allocation37_spill] sm:$0xff] %v2821_v56  ;;  %v2824_v58 = vld [vmem:[#allocation7] sm:$0xff]  ;;  %v2827_v33 = vld [vmem:[#allocation7 + $0x8] sm:$0xff] }
 0x34b   :  { %1181 = vmatpush.msra.mxu1 %v2812_v59  ;;  %1201 = vmatpush.msra.mxu2 %v2815_v60  ;;  %3243 = vst [vmem:[#allocation38_spill] sm:$0xff] %v2824_v58  ;;  %v2830_v59 = vld [vmem:[#allocation7 + $0x10] sm:$0xff]  ;;  %v2833_v60 = vld [vmem:[#allocation7 + $0x18] sm:$0xff] }
 0x34c   :  { %1221 = vmatpush.msra.mxu3 %v2818_v61  ;;  %1241 = vmatpush.msrb.mxu0 %v2821_v56  ;;  %3244 = vst [vmem:[#allocation39_spill] sm:$0xff] %v2827_v33 }
 0x34d   :  { %1182 = vmatpush.msra.mxu1 %v2824_v58  ;;  %1202 = vmatpush.msra.mxu2 %v2827_v33  ;;  %3245 = vst [vmem:[#allocation40_spill] sm:$0xff] %v2830_v59 }
 0x34e   :  { %1222 = vmatpush.msra.mxu3 %v2830_v59  ;;  %3246 = vst [vmem:[#allocation43_spill] sm:$0xff] %v2833_v60  ;;  %1242 = vmatpush.msrb.mxu0 %v2833_v60 }
 0x3aa   :  { %v869_v61 = vpop.f32.mrf.mxu1 }
 0x3ab   :  { %v936_v54 = vrot.slane %v869_v61, 2  ;;  %v929_v53 = vpop.f32.mrf.mxu0 }
 0x3ac   :  { %v939_v56 = vrot.slane %v929_v53, 2 }
 0x3ad   :  { %v944_v52 = vadd.f32 %v936_v54, %v3216_v55 }
 0x3ae   :  { %v947_v58 = vadd.f32 %v939_v56, %v3217_v57 }
 0x3af   :  { %v1735_v50 = vmul.f32 -1.442695, %v944_v52 }
 0x3b0   :  { %v1737_v49 = vmul.f32 -1.442695, %v947_v58  ;;  %v889_v48 = vpop.f32.mrf.mxu2 }
 0x3b1   :  { %1812 = vpow2.f32 %v1735_v50  ;;  %v937_v33 = vrot.slane %v889_v48, 2  ;;  %v909_v55 = vpop.f32.mrf.mxu3 }
 0x3b2   :  { %1814 = vpow2.f32 %v1737_v49  ;;  %v938_v54 = vrot.slane %v909_v55, 2 }
 0x3b3   :  { %v945_v59 = vadd.f32 %v937_v33, %v3218_v25 }
 0x3b4   :  { %v946_v25 = vadd.f32 %v938_v54, %v3219_v18 }
 0x3b5   :  { %v1736_v47 = vmul.f32 -1.442695, %v945_v59 }
 0x3b7   :  { %v1813_v46 = vpop.eup %1812  ;;  %1816 = vpow2.f32 %v1736_v47 }
 0x3b8   :  { %v1815_v60 = vpop.eup %1814  ;;  %v951_v45 = vadd.f32 1.0, %v1813_v46 }
 0x3b9   :  { %v990_v61 = vadd.f32 1.0, %v1815_v60 }
 0x3ba   :  { %1818 = vrcp.f32 %v951_v45  ;;  %v963_v33 = vand.u32 2147483648, %v951_v45  ;;  %vm957_vm7 = vweird.f32 %v951_v45  ;;  %v961_v60 = vand.u32 2147483647, %v951_v45 }
 0x3bb   :  { %1820 = vrcp.f32 %v990_v61  ;;  %vm996_vm15 = vweird.f32 %v990_v61 }
 0x3bc   :  { %vm962_vm11 = vcmp.eq.f32.partialorder %v961_v60, 8.507059e+37 }
 0x3bd   :  { %v1817_v53 = vpop.eup %1816 }
 0x3be   :  { %v970_v44 = vadd.f32 1.0, %v1817_v53 }
 0x3c0   :  { %v1819_v57 = vpop.eup %1818  ;;  %1822 = vrcp.f32 %v970_v44  ;;  %v982_v53 = vand.u32 2147483648, %v970_v44  ;;  %vm976_vm10 = vweird.f32 %v970_v44 }
 0x3c1   :  { %v953_v52 = vmul.f32 %v1819_v57, %v951_v45  ;;  %v1821_v48 = vpop.eup %1820  ;;  %vm958_vm6 = vweird.f32 %v1819_v57  ;;  %1824 = vtanh.f32 %v946_v25 }
 0x3c2   :  { %v992_v46 = vmul.f32 %v1821_v48, %v990_v61  ;;  %vm959_vm8 = vmor %vm957_vm7, %vm958_vm6  ;;  %v983_v54 = vor.u32 1.1754944e-38, %v982_v53  ;;  %vm997_vm14 = vweird.f32 %v1821_v48  ;;  %v3253_v53 = vld [vmem:[#allocation21_spill] sm:$0xff] }
 0x3c3   :  { %v954_v50 = vsub.f32 1.0, %v953_v52  ;;  %v980_v52 = vand.u32 2147483647, %v970_v44  ;;  %vm998_vm0 = vmor %vm996_vm15, %vm997_vm14 }
 0x3c4   :  { %v993_v42 = vsub.f32 1.0, %v992_v46 }
 0x3c5   :  { %v955_v49 = vmul.f32 %v1819_v57, %v954_v50  ;;  %v964_v50 = vor.u32 1.1754944e-38, %v963_v33  ;;  %vm981_vm13 = vcmp.eq.f32.partialorder %v980_v52, 8.507059e+37  ;;  %v3255_v52 = vld [vmem:[#allocation23_spill] sm:$0xff] }
 0x3c6   :  { %v1823_v56 = vpop.eup %1822  ;;  %v994_v39 = vmul.f32 %v1821_v48, %v993_v42  ;;  %v3250_v42 = vld [vmem:[#allocation18_spill] sm:$0xff] }
 0x3c7   :  { %v972_v58 = vmul.f32 %v1823_v56, %v970_v44  ;;  %v956_v47 = vadd.f32 %v1819_v57, %v955_v49  ;;  %vm977_vm9 = vweird.f32 %v1823_v56  ;;  %v1825_v45 = vpop.eup %1824  ;;  %v1002_v44 = vand.u32 2147483648, %v990_v61 }
 0x3c8   :  { %vm978_vm12 = vmor %vm976_vm10, %vm977_vm9 }
 0x3c9   :  { %v973_v59 = vsub.f32 1.0, %v972_v58  ;;  %v960_v55 = vsel %vm959_vm8, %v1819_v57, %v956_v47  ;;  %v995_v57 = vadd.f32 %v1821_v48, %v994_v39  ;;  %v1003_v46 = vor.u32 1.1754944e-38, %v1002_v44  ;;  %v3247_v39 = vld [vmem:[#allocation15_spill] sm:$0xff]  ;;  %v3265_v44 = vld [vmem:[#allocation33_spill] sm:$0xff] }
 0x3ca   :  { %v965_v49 = vsel %vm962_vm11, %v964_v50, %v960_v55  ;;  %v3254_v55 = vld [vmem:[#allocation22_spill] sm:$0xff]  ;;  %v3256_v50 = vld [vmem:[#allocation24_spill] sm:$0xff] }
 0x3cb   :  { %v974_v43 = vmul.f32 %v1823_v56, %v973_v59  ;;  %v1010_v59 = vmul.f32 %v1825_v45, %v965_v49  ;;  %v999_v47 = vsel %vm998_vm0, %v1821_v48, %v995_v57  ;;  %v3252_v48 = vld [vmem:[#allocation20_spill] sm:$0xff]  ;;  %v3259_v49 = vld [vmem:[#allocation27_spill] sm:$0xff]  ;;  %v3261_v45 = vld [vmem:[#allocation29_spill] sm:$0xff] }
 0x3cc   :  { %v3264_v57 = vld [vmem:[#allocation32_spill] sm:$0xff] }
 0x3cd   :  { %v975_v18 = vadd.f32 %v1823_v56, %v974_v43  ;;  %v1000_v43 = vand.u32 2147483647, %v990_v61  ;;  %v3251_v61 = vld [vmem:[#allocation19_spill] sm:$0xff] }
 0x3cf   :  { %v979_v58 = vsel %vm978_vm12, %v1823_v56, %v975_v18  ;;  %vm1001_vm1 = vcmp.eq.f32.partialorder %v1000_v43, 8.507059e+37  ;;  %v3257_v18 = vld [vmem:[#allocation25_spill] sm:$0xff]  ;;  %v3266_v43 = vld [vmem:[#allocation34_spill] sm:$0xff] }
 0x3d0   :  { %v984_v40 = vsel %vm981_vm13, %v983_v54, %v979_v58  ;;  %v1004_v56 = vsel %vm1001_vm1, %v1003_v46, %v999_v47  ;;  %v3258_v54 = vld [vmem:[#allocation26_spill] sm:$0xff]  ;;  %v3260_v58 = vld [vmem:[#allocation28_spill] sm:$0xff]  ;;  %v3267_v47 = vld [vmem:[#allocation35_spill] sm:$0xff] }
 0x3d1   :  { %v1009_v25 = vmul.f32 %v1007_v41, %v984_v40  ;;  %v3248_v40 = vld [vmem:[#allocation16_spill] sm:$0xff]  ;;  %v3249_v41 = vld [vmem:[#allocation17_spill] sm:$0xff] }
 0x3d2   :  { %v3268_v46 = vld [vmem:[#allocation36_spill] sm:$0xff] }
 0x3d3   :  { %v2841_v38 = vadd.f32 %v1010_v59, %v1009_v25  ;;  %v3262_v25 = vld [vmem:[#allocation30_spill] sm:$0xff]  ;;  %v3263_v59 = vld [vmem:[#allocation31_spill] sm:$0xff] }
 0x3d5   :  { %1826 = vtanh.f32 %v2841_v38 }
 0x3db   :  { %v1827_v51 = vpop.eup %1826 }
 0x3dc   :  { %v1013_v33 = vmul.f32 %v1827_v51, %v1004_v56  ;;  %v3269_v51 = vld [vmem:[#allocation37_spill] sm:$0xff]  ;;  %v3270_v56 = vld [vmem:[#allocation38_spill] sm:$0xff] }
 0x3de   :  { %v1015_v60 = vrot.slane %v1013_v33, 6  ;;  %v3271_v33 = vld [vmem:[#allocation39_spill] sm:$0xff] }
 0x3e0   :  { %1033 = vmatmul.f32.vlgmr.msrb.gmra.mxu1 %v1015_v60  ;;  %1053 = vmatmul.f32.vlgmr.msrb.gmra.mxu2 %v1015_v60 }
 0x3e1   :  { %1073 = vmatmul.f32.vlgmr.msrb.gmra.mxu3 %v1015_v60  ;;  %1093 = vmatmul.f32.vlgmr.msra.gmra.mxu0 %v1015_v60  ;;  %v3272_v60 = vld [vmem:[#allocation40_spill] sm:$0xff] }
 0x3e2   :  { %1332 = vmatpush.msrb.mxu1 %v2572_v63  ;;  %1352 = vmatpush.msrb.mxu2 %v2575_v62 }
 0x3e3   :  { %1372 = vmatpush.msrb.mxu3 %v2578_v0  ;;  %1392 = vmatpush.msra.mxu0 %v2581_v1 }
 0x3e4   :  { %1333 = vmatpush.msrb.mxu1 %v2584_v17  ;;  %1353 = vmatpush.msrb.mxu2 %v2587_v3 }
 0x3e5   :  { %1373 = vmatpush.msrb.mxu3 %v2590_v22  ;;  %1393 = vmatpush.msra.mxu0 %v2593_v8 }
 0x3e6   :  { %1334 = vmatpush.msrb.mxu1 %v2596_v2  ;;  %1354 = vmatpush.msrb.mxu2 %v2599_v23 }
 0x3e7   :  { %1374 = vmatpush.msrb.mxu3 %v2674_v24  ;;  %1394 = vmatpush.msra.mxu0 %v2677_v26 }
 0x3e8   :  { %1335 = vmatpush.msrb.mxu1 %v2680_v27  ;;  %1355 = vmatpush.msrb.mxu2 %v2683_v28 }
 0x3e9   :  { %1375 = vmatpush.msrb.mxu3 %v2686_v29  ;;  %1395 = vmatpush.msra.mxu0 %v2689_v30 }
 0x3ea   :  { %1336 = vmatpush.msrb.mxu1 %v2692_v31  ;;  %1356 = vmatpush.msrb.mxu2 %v2695_v32 }
 0x3eb   :  { %1376 = vmatpush.msrb.mxu3 %v2698_v14  ;;  %1396 = vmatpush.msra.mxu0 %v2701_v13 }
 0x3ec   :  { %1337 = vmatpush.msrb.mxu1 %v2704_v12  ;;  %1357 = vmatpush.msrb.mxu2 %v2707_v19 }
 0x3ed   :  { %1377 = vmatpush.msrb.mxu3 %v2710_v7  ;;  %1397 = vmatpush.msra.mxu0 %v2713_v21 }
 0x3ee   :  { %1338 = vmatpush.msrb.mxu1 %v2716_v16  ;;  %1358 = vmatpush.msrb.mxu2 %v2719_v5 }
 0x3ef   :  { %1378 = vmatpush.msrb.mxu3 %v2722_v10  ;;  %1398 = vmatpush.msra.mxu0 %v2725_v15 }
 0x3f0   :  { %1339 = vmatpush.msrb.mxu1 %v2728_v6  ;;  %1359 = vmatpush.msrb.mxu2 %v2731_v9 }
 0x3f1   :  { %1379 = vmatpush.msrb.mxu3 %v2734_v11  ;;  %1399 = vmatpush.msra.mxu0 %v2737_v4 }
 0x3f2   :  { %1340 = vmatpush.msrb.mxu1 %v2740_v20  ;;  %1360 = vmatpush.msrb.mxu2 %v2743_v34 }
 0x3f3   :  { %1380 = vmatpush.msrb.mxu3 %v2746_v35  ;;  %1400 = vmatpush.msra.mxu0 %v2749_v36 }
 0x3f4   :  { %1341 = vmatpush.msrb.mxu1 %v2752_v37  ;;  %1361 = vmatpush.msrb.mxu2 %v3247_v39 }
 0x3f5   :  { %1381 = vmatpush.msrb.mxu3 %v3248_v40  ;;  %1401 = vmatpush.msra.mxu0 %v3249_v41 }
 0x3f6   :  { %1342 = vmatpush.msrb.mxu1 %v3250_v42  ;;  %1362 = vmatpush.msrb.mxu2 %v3251_v61 }
 0x3f7   :  { %1382 = vmatpush.msrb.mxu3 %v3252_v48  ;;  %1402 = vmatpush.msra.mxu0 %v3253_v53 }
 0x3f8   :  { %1343 = vmatpush.msrb.mxu1 %v3254_v55  ;;  %1363 = vmatpush.msrb.mxu2 %v3255_v52 }
 0x3f9   :  { %1383 = vmatpush.msrb.mxu3 %v3256_v50  ;;  %1403 = vmatpush.msra.mxu0 %v3257_v18 }
 0x3fa   :  { %1344 = vmatpush.msrb.mxu1 %v3258_v54  ;;  %1364 = vmatpush.msrb.mxu2 %v3259_v49 }
 0x3fb   :  { %1384 = vmatpush.msrb.mxu3 %v3260_v58  ;;  %1404 = vmatpush.msra.mxu0 %v3261_v45  ;;  %v3275_v58 = vld [vmem:[#allocation42_spill] sm:$0xff] }
 0x3fc   :  { %1345 = vmatpush.msrb.mxu1 %v3262_v25  ;;  %1365 = vmatpush.msrb.mxu2 %v3263_v59  ;;  %v3273_v25 = vld [vmem:[#allocation43_spill] sm:$0xff] }
 0x3fd   :  { %1385 = vmatpush.msrb.mxu3 %v3264_v57  ;;  %1405 = vmatpush.msra.mxu0 %v3265_v44  ;;  %v3274_v57 = vld [vmem:[#allocation41_spill] sm:$0xff] }
 0x3fe   :  { %1346 = vmatpush.msrb.mxu1 %v3266_v43  ;;  %1366 = vmatpush.msrb.mxu2 %v3267_v47 }
 0x3ff   :  { %1386 = vmatpush.msrb.mxu3 %v3268_v46  ;;  %1406 = vmatpush.msra.mxu0 %v3269_v51  ;;  %v3276_v51 = vld [vmem:[#allocation44_spill] sm:$0xff] }
 0x400   :  { %1347 = vmatpush.msrb.mxu1 %v3270_v56  ;;  %1367 = vmatpush.msrb.mxu2 %v3271_v33 }
 0x401   :  { %1387 = vmatpush.msrb.mxu3 %v3272_v60  ;;  %1407 = vmatpush.msra.mxu0 %v3273_v25 }
 0x45d   :  { %v1034_v59 = vpop.f32.mrf.mxu1 }
 0x45e   :  { %v1097_v45 = vadd.f32 %v1034_v59, %v3274_v57  ;;  %v1094_v44 = vpop.f32.mrf.mxu0  ;;  %v3277_v57 = vld [vmem:[#allocation46_spill] sm:$0xff] }
 0x45f   :  { %v1100_v43 = vadd.f32 %v1094_v44, %v3275_v58 }
 0x460   :  { %v1738_v49 = vmul.f32 -1.442695, %v1097_v45 }
 0x461   :  { %v1740_v47 = vmul.f32 -1.442695, %v1100_v43 }
 0x462   :  { %1828 = vpow2.f32 %v1738_v49 }
 0x463   :  { %1830 = vpow2.f32 %v1740_v47  ;;  %v1054_v46 = vpop.f32.mrf.mxu2 }
 0x464   :  { %v1098_v54 = vadd.f32 %v1054_v46, %v3276_v51  ;;  %v1074_v43 = vpop.f32.mrf.mxu3 }
 0x465   :  { %v1099_v46 = vadd.f32 %v1074_v43, %v3277_v57 }
 0x466   :  { %v1739_v56 = vmul.f32 -1.442695, %v1098_v54 }
 0x468   :  { %v1829_v18 = vpop.eup %1828  ;;  %1832 = vpow2.f32 %v1739_v56 }
 0x469   :  { %v1831_v33 = vpop.eup %1830  ;;  %v1104_v60 = vadd.f32 1.0, %v1829_v18 }
 0x46a   :  { %v1143_v25 = vadd.f32 1.0, %v1831_v33 }
 0x46b   :  { %1834 = vrcp.f32 %v1104_v60  ;;  %v1116_v18 = vand.u32 2147483648, %v1104_v60  ;;  %vm1110_vm3 = vweird.f32 %v1104_v60  ;;  %v1114_v33 = vand.u32 2147483647, %v1104_v60 }
 0x46c   :  { %1836 = vrcp.f32 %v1143_v25  ;;  %vm1149_vm11 = vweird.f32 %v1143_v25 }
 0x46d   :  { %vm1115_vm7 = vcmp.eq.f32.partialorder %v1114_v33, 8.507059e+37 }
 0x46e   :  { %v1833_v50 = vpop.eup %1832 }
 0x46f   :  { %v1123_v52 = vadd.f32 1.0, %v1833_v50 }
 0x471   :  { %v1835_v59 = vpop.eup %1834  ;;  %1838 = vrcp.f32 %v1123_v52  ;;  %v1135_v50 = vand.u32 2147483648, %v1123_v52  ;;  %v1133_v48 = vand.u32 2147483647, %v1123_v52  ;;  %vm1129_vm6 = vweird.f32 %v1123_v52 }
 0x472   :  { %v1106_v44 = vmul.f32 %v1835_v59, %v1104_v60  ;;  %v1837_v49 = vpop.eup %1836  ;;  %vm1111_vm2 = vweird.f32 %v1835_v59  ;;  %1840 = vtanh.f32 %v1099_v46 }
 0x473   :  { %v1145_v56 = vmul.f32 %v1837_v49, %v1143_v25  ;;  %vm1112_vm4 = vmor %vm1110_vm3, %vm1111_vm2  ;;  %vm1134_vm9 = vcmp.eq.f32.partialorder %v1133_v48, 8.507059e+37  ;;  %vm1150_vm10 = vweird.f32 %v1837_v49 }
 0x474   :  { %v1107_v45 = vsub.f32 1.0, %v1106_v44  ;;  %vm1151_vm12 = vmor %vm1149_vm11, %vm1150_vm10 }
 0x475   :  { %v1146_v61 = vsub.f32 1.0, %v1145_v56 }
 0x476   :  { %v1108_v47 = vmul.f32 %v1835_v59, %v1107_v45  ;;  %v1117_v45 = vor.u32 1.1754944e-38, %v1116_v18 }
 0x477   :  { %v1839_v58 = vpop.eup %1838  ;;  %v1147_v40 = vmul.f32 %v1837_v49, %v1146_v61 }
 0x478   :  { %v1125_v54 = vmul.f32 %v1839_v58, %v1123_v52  ;;  %v1109_v51 = vadd.f32 %v1835_v59, %v1108_v47  ;;  %vm1130_vm5 = vweird.f32 %v1839_v58  ;;  %v1136_v47 = vor.u32 1.1754944e-38, %v1135_v50  ;;  %v1841_v60 = vpop.eup %1840 }
 0x479   :  { %vm1131_vm8 = vmor %vm1129_vm6, %vm1130_vm5  ;;  %v1155_v52 = vand.u32 2147483648, %v1143_v25 }
 0x47a   :  { %v1126_v55 = vsub.f32 1.0, %v1125_v54  ;;  %v1113_v44 = vsel %vm1112_vm4, %v1835_v59, %v1109_v51  ;;  %v1160_v54 = vrot.slane %v2841_v38, 6  ;;  %v1148_v51 = vadd.f32 %v1837_v49, %v1147_v40 }
 0x47b   :  { %v1118_v57 = vsel %vm1115_vm7, %v1117_v45, %v1113_v44 }
 0x47c   :  { %v1127_v53 = vmul.f32 %v1839_v58, %v1126_v55  ;;  %v1163_v55 = vmul.f32 %v1841_v60, %v1118_v57  ;;  %v1152_v59 = vsel %vm1151_vm12, %v1837_v49, %v1148_v51 }
 0x47e   :  { %v1128_v43 = vadd.f32 %v1839_v58, %v1127_v53  ;;  %v1153_v53 = vand.u32 2147483647, %v1143_v25 }
 0x480   :  { %v1132_v42 = vsel %vm1131_vm8, %v1839_v58, %v1128_v43  ;;  %v1156_v58 = vor.u32 1.1754944e-38, %v1155_v52  ;;  %vm1154_vm13 = vcmp.eq.f32.partialorder %v1153_v53, 8.507059e+37  ;;  %v3308_v52 = vld [vmem:[#allocation46_spill] sm:$0xff] }
 0x481   :  { %v1137_v41 = vsel %vm1134_vm9, %v1136_v47, %v1132_v42  ;;  %v3307_v42 = vld [vmem:[#allocation44_spill] sm:$0xff] }
 0x482   :  { %v1162_v46 = vmul.f32 %v1160_v54, %v1137_v41  ;;  %v1157_v38 = vsel %vm1154_vm13, %v1156_v58, %v1152_v59 }
 0x484   :  { %v2913_v39 = vadd.f32 %v1163_v55, %v1162_v46 }
 0x486   :  { %1842 = vtanh.f32 %v2913_v39 }
 0x48c   :  { %v1843_v48 = vpop.eup %1842 }
 0x48d   :  { %v1166_v56 = vmul.f32 %v1843_v48, %v1157_v38 }
 0x48f   :  { %1183 = vmatmul.f32.vlgmr.msra.gmra.mxu1 %v1166_v56  ;;  %1203 = vmatmul.f32.vlgmr.msra.gmra.mxu2 %v1166_v56 }
 0x490   :  { %1223 = vmatmul.f32.vlgmr.msra.gmra.mxu3 %v1166_v56  ;;  %1243 = vmatmul.f32.vlgmr.msrb.gmra.mxu0 %v1166_v56 }
 0x491   :  { %1497 = vmatpush.msra.mxu1 %v2572_v63  ;;  %1517 = vmatpush.msra.mxu2 %v2575_v62  ;;  %v3278_v63 = vld [vmem:[#allocation15_spill] sm:$0xff]  ;;  %v3279_v62 = vld [vmem:[#allocation16_spill] sm:$0xff] }
 0x492   :  { %1537 = vmatpush.msra.mxu3 %v2578_v0  ;;  %1557 = vmatpush.msrb.mxu0 %v2581_v1  ;;  %v3280_v0 = vld [vmem:[#allocation17_spill] sm:$0xff]  ;;  %v3281_v1 = vld [vmem:[#allocation18_spill] sm:$0xff] }
 0x493   :  { %1498 = vmatpush.msra.mxu1 %v2584_v17  ;;  %1518 = vmatpush.msra.mxu2 %v2587_v3  ;;  %v3282_v17 = vld [vmem:[#allocation19_spill] sm:$0xff]  ;;  %v3283_v3 = vld [vmem:[#allocation20_spill] sm:$0xff] }
 0x494   :  { %1538 = vmatpush.msra.mxu3 %v2590_v22  ;;  %1558 = vmatpush.msrb.mxu0 %v2593_v8  ;;  %v3284_v22 = vld [vmem:[#allocation21_spill] sm:$0xff]  ;;  %v3285_v8 = vld [vmem:[#allocation22_spill] sm:$0xff] }
 0x495   :  { %1499 = vmatpush.msra.mxu1 %v2596_v2  ;;  %1519 = vmatpush.msra.mxu2 %v2599_v23  ;;  %v3286_v2 = vld [vmem:[#allocation23_spill] sm:$0xff]  ;;  %v3287_v23 = vld [vmem:[#allocation24_spill] sm:$0xff] }
 0x496   :  { %1539 = vmatpush.msra.mxu3 %v2674_v24  ;;  %1559 = vmatpush.msrb.mxu0 %v2677_v26  ;;  %v3288_v24 = vld [vmem:[#allocation25_spill] sm:$0xff]  ;;  %v3289_v26 = vld [vmem:[#allocation26_spill] sm:$0xff] }
 0x497   :  { %1500 = vmatpush.msra.mxu1 %v2680_v27  ;;  %1520 = vmatpush.msra.mxu2 %v2683_v28  ;;  %v3290_v27 = vld [vmem:[#allocation27_spill] sm:$0xff]  ;;  %v3291_v28 = vld [vmem:[#allocation28_spill] sm:$0xff] }
 0x498   :  { %1540 = vmatpush.msra.mxu3 %v2686_v29  ;;  %1560 = vmatpush.msrb.mxu0 %v2689_v30  ;;  %v3292_v29 = vld [vmem:[#allocation29_spill] sm:$0xff]  ;;  %v3293_v30 = vld [vmem:[#allocation30_spill] sm:$0xff] }
 0x499   :  { %1501 = vmatpush.msra.mxu1 %v2692_v31  ;;  %1521 = vmatpush.msra.mxu2 %v2695_v32  ;;  %v3294_v31 = vld [vmem:[#allocation31_spill] sm:$0xff]  ;;  %v3295_v32 = vld [vmem:[#allocation32_spill] sm:$0xff] }
 0x49a   :  { %1541 = vmatpush.msra.mxu3 %v2698_v14  ;;  %1561 = vmatpush.msrb.mxu0 %v2701_v13  ;;  %v3296_v14 = vld [vmem:[#allocation33_spill] sm:$0xff]  ;;  %v3297_v13 = vld [vmem:[#allocation34_spill] sm:$0xff] }
 0x49b   :  { %1502 = vmatpush.msra.mxu1 %v2704_v12  ;;  %1522 = vmatpush.msra.mxu2 %v2707_v19  ;;  %v3298_v12 = vld [vmem:[#allocation35_spill] sm:$0xff]  ;;  %v3299_v19 = vld [vmem:[#allocation36_spill] sm:$0xff] }
 0x49c   :  { %1542 = vmatpush.msra.mxu3 %v2710_v7  ;;  %1562 = vmatpush.msrb.mxu0 %v2713_v21  ;;  %v3300_v7 = vld [vmem:[#allocation37_spill] sm:$0xff]  ;;  %v3301_v21 = vld [vmem:[#allocation38_spill] sm:$0xff] }
 0x49d   :  { %1503 = vmatpush.msra.mxu1 %v2716_v16  ;;  %1523 = vmatpush.msra.mxu2 %v2719_v5  ;;  %v3302_v16 = vld [vmem:[#allocation39_spill] sm:$0xff]  ;;  %v3303_v5 = vld [vmem:[#allocation40_spill] sm:$0xff] }
 0x49e   :  { %1543 = vmatpush.msra.mxu3 %v2722_v10  ;;  %1563 = vmatpush.msrb.mxu0 %v2725_v15  ;;  %v3304_v10 = vld [vmem:[#allocation43_spill] sm:$0xff] }
 0x49f   :  { %1504 = vmatpush.msra.mxu1 %v2728_v6  ;;  %1524 = vmatpush.msra.mxu2 %v2731_v9 }
 0x4a0   :  { %1544 = vmatpush.msra.mxu3 %v2734_v11  ;;  %1564 = vmatpush.msrb.mxu0 %v2737_v4  ;;  %v3305_v4 = vld [vmem:[#allocation41_spill] sm:$0xff] }
 0x4a1   :  { %1505 = vmatpush.msra.mxu1 %v2740_v20  ;;  %1525 = vmatpush.msra.mxu2 %v2743_v34  ;;  %v3306_v34 = vld [vmem:[#allocation42_spill] sm:$0xff] }
 0x4a2   :  { %1545 = vmatpush.msra.mxu3 %v2746_v35  ;;  %1565 = vmatpush.msrb.mxu0 %v2749_v36 }
 0x4a3   :  { %1506 = vmatpush.msra.mxu1 %v2752_v37  ;;  %1526 = vmatpush.msra.mxu2 %v3278_v63 }
 0x4a4   :  { %1546 = vmatpush.msra.mxu3 %v3279_v62  ;;  %1566 = vmatpush.msrb.mxu0 %v3280_v0 }
 0x4a5   :  { %1507 = vmatpush.msra.mxu1 %v3281_v1  ;;  %1527 = vmatpush.msra.mxu2 %v3282_v17 }
 0x4a6   :  { %1547 = vmatpush.msra.mxu3 %v3283_v3  ;;  %1567 = vmatpush.msrb.mxu0 %v3284_v22 }
 0x4a7   :  { %1508 = vmatpush.msra.mxu1 %v3285_v8  ;;  %1528 = vmatpush.msra.mxu2 %v3286_v2 }
 0x4a8   :  { %1548 = vmatpush.msra.mxu3 %v3287_v23  ;;  %1568 = vmatpush.msrb.mxu0 %v3288_v24  ;;  %v1322_v24 = vrot.slane %v2913_v39, 6 }
 0x4a9   :  { %1509 = vmatpush.msra.mxu1 %v3289_v26  ;;  %1529 = vmatpush.msra.mxu2 %v3290_v27 }
 0x4aa   :  { %1549 = vmatpush.msra.mxu3 %v3291_v28  ;;  %1569 = vmatpush.msrb.mxu0 %v3292_v29 }
 0x4ab   :  { %1510 = vmatpush.msra.mxu1 %v3293_v30  ;;  %1530 = vmatpush.msra.mxu2 %v3294_v31 }
 0x4ac   :  { %1550 = vmatpush.msra.mxu3 %v3295_v32  ;;  %1570 = vmatpush.msrb.mxu0 %v3296_v14 }
 0x4ad   :  { %1511 = vmatpush.msra.mxu1 %v3297_v13  ;;  %1531 = vmatpush.msra.mxu2 %v3298_v12 }
 0x4ae   :  { %1551 = vmatpush.msra.mxu3 %v3299_v19  ;;  %1571 = vmatpush.msrb.mxu0 %v3300_v7 }
 0x4af   :  { %1512 = vmatpush.msra.mxu1 %v3301_v21  ;;  %1532 = vmatpush.msra.mxu2 %v3302_v16 }
 0x4b0   :  { %1552 = vmatpush.msra.mxu3 %v3303_v5  ;;  %1572 = vmatpush.msrb.mxu0 %v3304_v10 }
 0x50c   :  { %v1184_v15 = vpop.f32.mrf.mxu1 }
 0x50d   :  { %v1251_v6 = vrot.slane %v1184_v15, 6  ;;  %v1244_v9 = vpop.f32.mrf.mxu0 }
 0x50e   :  { %v1254_v11 = vrot.slane %v1244_v9, 6 }
 0x50f   :  { %v1259_v20 = vadd.f32 %v1251_v6, %v3305_v4 }
 0x510   :  { %v1262_v35 = vadd.f32 %v1254_v11, %v3306_v34 }
 0x511   :  { %v1741_v36 = vmul.f32 -1.442695, %v1259_v20 }
 0x512   :  { %v1743_v37 = vmul.f32 -1.442695, %v1262_v35  ;;  %v1204_v40 = vpop.f32.mrf.mxu2 }
 0x513   :  { %1844 = vpow2.f32 %v1741_v36  ;;  %v1252_v41 = vrot.slane %v1204_v40, 6  ;;  %v1224_v45 = vpop.f32.mrf.mxu3 }
 0x514   :  { %1846 = vpow2.f32 %v1743_v37  ;;  %v1253_v54 = vrot.slane %v1224_v45, 6 }
 0x515   :  { %v1260_v61 = vadd.f32 %v1252_v41, %v3307_v42 }
 0x516   :  { %v1261_v53 = vadd.f32 %v1253_v54, %v3308_v52 }
 0x517   :  { %v1742_v25 = vmul.f32 -1.442695, %v1260_v61 }
 0x519   :  { %v1845_v57 = vpop.eup %1844  ;;  %1848 = vpow2.f32 %v1742_v25 }
 0x51a   :  { %v1847_v49 = vpop.eup %1846  ;;  %v1266_v18 = vadd.f32 1.0, %v1845_v57 }
 0x51b   :  { %v1305_v33 = vadd.f32 1.0, %v1847_v49 }
 0x51c   :  { %1850 = vrcp.f32 %v1266_v18  ;;  %v1278_v38 = vand.u32 2147483648, %v1266_v18  ;;  %vm1272_vm15 = vweird.f32 %v1266_v18  ;;  %v1276_v63 = vand.u32 2147483647, %v1266_v18 }
 0x51d   :  { %1852 = vrcp.f32 %v1305_v33  ;;  %v1317_v13 = vand.u32 2147483648, %v1305_v33  ;;  %vm1311_vm7 = vweird.f32 %v1305_v33  ;;  %v1315_v12 = vand.u32 2147483647, %v1305_v33 }
 0x51e   :  { %v1279_v22 = vor.u32 1.1754944e-38, %v1278_v38  ;;  %vm1277_vm3 = vcmp.eq.f32.partialorder %v1276_v63, 8.507059e+37 }
 0x51f   :  { %v1849_v50 = vpop.eup %1848  ;;  %v1318_v7 = vor.u32 1.1754944e-38, %v1317_v13  ;;  %vm1316_vm9 = vcmp.eq.f32.partialorder %v1315_v12, 8.507059e+37 }
 0x520   :  { %v1285_v44 = vadd.f32 1.0, %v1849_v50 }
 0x522   :  { %v1851_v43 = vpop.eup %1850  ;;  %1854 = vrcp.f32 %v1285_v44  ;;  %v1297_v62 = vand.u32 2147483648, %v1285_v44  ;;  %v1295_v17 = vand.u32 2147483647, %v1285_v44  ;;  %vm1291_vm2 = vweird.f32 %v1285_v44 }
 0x523   :  { %v1268_v47 = vmul.f32 %v1851_v43, %v1266_v18  ;;  %v1853_v46 = vpop.eup %1852  ;;  %vm1273_vm14 = vweird.f32 %v1851_v43  ;;  %1856 = vtanh.f32 %v1261_v53 }
 0x524   :  { %v1307_v48 = vmul.f32 %v1853_v46, %v1305_v33  ;;  %vm1274_vm0 = vmor %vm1272_vm15, %vm1273_vm14  ;;  %v1298_v2 = vor.u32 1.1754944e-38, %v1297_v62  ;;  %vm1296_vm5 = vcmp.eq.f32.partialorder %v1295_v17, 8.507059e+37  ;;  %vm1312_vm6 = vweird.f32 %v1853_v46 }
 0x525   :  { %v1269_v60 = vsub.f32 1.0, %v1268_v47  ;;  %vm1313_vm8 = vmor %vm1311_vm7, %vm1312_vm6 }
 0x526   :  { %v1308_v3 = vsub.f32 1.0, %v1307_v48 }
 0x527   :  { %v1270_v55 = vmul.f32 %v1851_v43, %v1269_v60 }
 0x528   :  { %v1855_v51 = vpop.eup %1854  ;;  %v1309_v29 = vmul.f32 %v1853_v46, %v1308_v3 }
 0x529   :  { %v1287_v59 = vmul.f32 %v1855_v51, %v1285_v44  ;;  %v1271_v58 = vadd.f32 %v1851_v43, %v1270_v55  ;;  %vm1292_vm1 = vweird.f32 %v1855_v51  ;;  %v1857_v27 = vpop.eup %1856 }
 0x52a   :  { %vm1293_vm4 = vmor %vm1291_vm2, %vm1292_vm1  ;;  %v1310_v14 = vadd.f32 %v1853_v46, %v1309_v29 }
 0x52b   :  { %v1288_v56 = vsub.f32 1.0, %v1287_v59  ;;  %v1275_v1 = vsel %vm1274_vm0, %v1851_v43, %v1271_v58 }
 0x52c   :  { %v1280_v23 = vsel %vm1277_vm3, %v1279_v22, %v1275_v1  ;;  %v1314_v19 = vsel %vm1313_vm8, %v1853_v46, %v1310_v14 }
 0x52d   :  { %v1289_v0 = vmul.f32 %v1855_v51, %v1288_v56  ;;  %v1325_v31 = vmul.f32 %v1857_v27, %v1280_v23  ;;  %v1319_v21 = vsel %vm1316_vm9, %v1318_v7, %v1314_v19 }
 0x52f   :  { %v1290_v8 = vadd.f32 %v1855_v51, %v1289_v0 }
 0x531   :  { %v1294_v26 = vsel %vm1293_vm4, %v1855_v51, %v1290_v8 }
 0x532   :  { %v1299_v28 = vsel %vm1296_vm5, %v1298_v2, %v1294_v26 }
 0x533   :  { %v1324_v30 = vmul.f32 %v1322_v24, %v1299_v28 }
 0x535   :  { %v2985_v32 = vadd.f32 %v1325_v31, %v1324_v30 }
 0x537   :  { %1858 = vtanh.f32 %v2985_v32  ;;  %v1487_v23 = vrot.slane %v2985_v32, 6 }
 0x53d   :  { %v1859_v39 = vpop.eup %1858 }
 0x53e   :  { %v1328_v16 = vmul.f32 %v1859_v39, %v1319_v21 }
 0x540   :  { %v1330_v5 = vrot.slane %v1328_v16, 2 }
 0x542   :  { %1348 = vmatmul.f32.vlgmr.msrb.gmra.mxu1 %v1330_v5  ;;  %1368 = vmatmul.f32.vlgmr.msrb.gmra.mxu2 %v1330_v5 }
 0x543   :  { %1388 = vmatmul.f32.vlgmr.msrb.gmra.mxu3 %v1330_v5  ;;  %1408 = vmatmul.f32.vlgmr.msra.gmra.mxu0 %v1330_v5  ;;  %v1674_v5 = vld [vmem:[#allocation8 + $0x78] sm:$0xff] }
 0x544   :  { %1682 = vmatpush.msrb.mxu1 %v1674_v5 }
 0x5bf   :  { %v1349_v10 = vpop.f32.mrf.mxu1 }
 0x5c0   :  { %v1416_v15 = vrot.slane %v1349_v10, 4  ;;  %v1409_v6 = vpop.f32.mrf.mxu0  ;;  %v1673_v10 = vld [vmem:[#allocation8 + $0x70] sm:$0xff] }
 0x5c1   :  { %v1419_v9 = vrot.slane %v1409_v6, 4  ;;  %1683 = vmatpush.msrb.mxu1 %v1673_v10  ;;  %v1671_v6 = vld [vmem:[#allocation8 + $0x60] sm:$0xff] }
 0x5c2   :  { %v1424_v11 = vadd.f32 %v1416_v15, %v3305_v4  ;;  %v1672_v15 = vld [vmem:[#allocation8 + $0x68] sm:$0xff] }
 0x5c3   :  { %v1427_v20 = vadd.f32 %v1419_v9, %v3306_v34  ;;  %1684 = vmatpush.msrb.mxu1 %v1672_v15  ;;  %v1670_v9 = vld [vmem:[#allocation8 + $0x58] sm:$0xff] }
 0x5c4   :  { %v1744_v35 = vmul.f32 -1.442695, %v1424_v11 }
 0x5c5   :  { %v1746_v36 = vmul.f32 -1.442695, %v1427_v20  ;;  %v1369_v37 = vpop.f32.mrf.mxu2  ;;  %1685 = vmatpush.msrb.mxu1 %v1671_v6 }
 0x5c6   :  { %1860 = vpow2.f32 %v1744_v35  ;;  %v1417_v40 = vrot.slane %v1369_v37, 4  ;;  %v1389_v44 = vpop.f32.mrf.mxu3 }
 0x5c7   :  { %1862 = vpow2.f32 %v1746_v36  ;;  %v1418_v47 = vrot.slane %v1389_v44, 4  ;;  %1686 = vmatpush.msrb.mxu1 %v1670_v9  ;;  %v1669_v36 = vld [vmem:[#allocation8 + $0x50] sm:$0xff] }
 0x5c8   :  { %v1425_v41 = vadd.f32 %v1417_v40, %v3307_v42 }
 0x5c9   :  { %v1426_v51 = vadd.f32 %v1418_v47, %v3308_v52  ;;  %1687 = vmatpush.msrb.mxu1 %v1669_v36  ;;  %v1663_v47 = vld [vmem:[#allocation8 + $0x20] sm:$0xff] }
 0x5ca   :  { %v1745_v61 = vmul.f32 -1.442695, %v1425_v41  ;;  %v1668_v41 = vld [vmem:[#allocation8 + $0x48] sm:$0xff] }
 0x5cb   :  { %1688 = vmatpush.msrb.mxu1 %v1668_v41  ;;  %v1763_v41 = vld [vmem:[%s3013_s6] ss:$0 sm:$0xff] }
 0x5cc   :  { %v1861_v25 = vpop.eup %1860  ;;  %1864 = vpow2.f32 %v1745_v61 }
 0x5cd   :  { %v1863_v57 = vpop.eup %1862  ;;  %v1431_v49 = vadd.f32 1.0, %v1861_v25 }
 0x5ce   :  { %v1470_v18 = vadd.f32 1.0, %v1863_v57  ;;  %v1667_v57 = vld [vmem:[#allocation8 + $0x40] sm:$0xff] }
 0x5cf   :  { %1866 = vrcp.f32 %v1431_v49  ;;  %v1443_v48 = vand.u32 2147483648, %v1431_v49  ;;  %vm1437_vm11 = vweird.f32 %v1431_v49  ;;  %v1441_v56 = vand.u32 2147483647, %v1431_v49  ;;  %1689 = vmatpush.msrb.mxu1 %v1667_v57 }
 0x5d0   :  { %1868 = vrcp.f32 %v1470_v18  ;;  %v1482_v13 = vand.u32 2147483648, %v1470_v18  ;;  %vm1476_vm3 = vweird.f32 %v1470_v18  ;;  %v1480_v12 = vand.u32 2147483647, %v1470_v18 }
 0x5d1   :  { %v1444_v3 = vor.u32 1.1754944e-38, %v1443_v48  ;;  %vm1442_vm15 = vcmp.eq.f32.partialorder %v1441_v56, 8.507059e+37 }
 0x5d2   :  { %v1865_v33 = vpop.eup %1864  ;;  %v1483_v7 = vor.u32 1.1754944e-38, %v1482_v13  ;;  %vm1481_vm5 = vcmp.eq.f32.partialorder %v1480_v12, 8.507059e+37 }
 0x5d3   :  { %v1450_v50 = vadd.f32 1.0, %v1865_v33 }
 0x5d5   :  { %v1867_v45 = vpop.eup %1866  ;;  %1870 = vrcp.f32 %v1450_v50  ;;  %v1462_v63 = vand.u32 2147483648, %v1450_v50  ;;  %v1460_v1 = vand.u32 2147483647, %v1450_v50  ;;  %vm1456_vm14 = vweird.f32 %v1450_v50 }
 0x5d6   :  { %v1433_v43 = vmul.f32 %v1867_v45, %v1431_v49  ;;  %v1869_v60 = vpop.eup %1868  ;;  %vm1438_vm10 = vweird.f32 %v1867_v45  ;;  %1872 = vtanh.f32 %v1426_v51 }
 0x5d7   :  { %v1472_v58 = vmul.f32 %v1869_v60, %v1470_v18  ;;  %vm1439_vm12 = vmor %vm1437_vm11, %vm1438_vm10  ;;  %v1463_v8 = vor.u32 1.1754944e-38, %v1462_v63  ;;  %vm1461_vm1 = vcmp.eq.f32.partialorder %v1460_v1, 8.507059e+37  ;;  %vm1477_vm2 = vweird.f32 %v1869_v60 }
 0x5d8   :  { %v1434_v54 = vsub.f32 1.0, %v1433_v43  ;;  %vm1478_vm4 = vmor %vm1476_vm3, %vm1477_vm2 }
 0x5d9   :  { %v1473_v17 = vsub.f32 1.0, %v1472_v58 }
 0x5da   :  { %v1435_v46 = vmul.f32 %v1867_v45, %v1434_v54  ;;  %v1662_v54 = vld [vmem:[#allocation8 + $0x18] sm:$0xff] }
 0x5db   :  { %v1871_v55 = vpop.eup %1870  ;;  %v1474_v28 = vmul.f32 %v1869_v60, %v1473_v17 }
 0x5dc   :  { %v1452_v53 = vmul.f32 %v1871_v55, %v1450_v50  ;;  %v1436_v59 = vadd.f32 %v1867_v45, %v1435_v46  ;;  %vm1457_vm13 = vweird.f32 %v1871_v55  ;;  %v1873_v26 = vpop.eup %1872  ;;  %v1666_v50 = vld [vmem:[#allocation8 + $0x38] sm:$0xff] }
 0x5dd   :  { %vm1458_vm0 = vmor %vm1456_vm14, %vm1457_vm13  ;;  %v1475_v14 = vadd.f32 %v1869_v60, %v1474_v28  ;;  %1690 = vmatpush.msrb.mxu1 %v1666_v50 }
 0x5de   :  { %v1453_v38 = vsub.f32 1.0, %v1452_v53  ;;  %v1440_v0 = vsel %vm1439_vm12, %v1867_v45, %v1436_v59  ;;  %v1665_v45 = vld [vmem:[#allocation8 + $0x30] sm:$0xff]  ;;  %v1660_v53 = vld [vmem:[#allocation8 + $0x8] sm:$0xff] }
 0x5df   :  { %v1445_v2 = vsel %vm1442_vm15, %v1444_v3, %v1440_v0  ;;  %v1479_v19 = vsel %vm1478_vm4, %v1869_v60, %v1475_v14  ;;  %1691 = vmatpush.msrb.mxu1 %v1665_v45 }
 0x5e0   :  { %v1454_v62 = vmul.f32 %v1871_v55, %v1453_v38  ;;  %v1490_v30 = vmul.f32 %v1873_v26, %v1445_v2  ;;  %v1484_v39 = vsel %vm1481_vm5, %v1483_v7, %v1479_v19 }
 0x5e2   :  { %v1455_v22 = vadd.f32 %v1871_v55, %v1454_v62 }
 0x5e4   :  { %v1459_v24 = vsel %vm1458_vm0, %v1871_v55, %v1455_v22  ;;  %v1661_v55 = vld [vmem:[#allocation8 + $0x10] sm:$0xff] }
 0x5e5   :  { %v1464_v27 = vsel %vm1461_vm1, %v1463_v8, %v1459_v24 }
 0x5e6   :  { %v1489_v29 = vmul.f32 %v1487_v23, %v1464_v27 }
 0x5e8   :  { %v2993_v31 = vadd.f32 %v1490_v30, %v1489_v29 }
 0x5ea   :  { %1874 = vtanh.f32 %v2993_v31  ;;  %v1652_v7 = vrot.slane %v2993_v31, 6 }
 0x5f0   :  { %v1875_v32 = vpop.eup %1874 }
 0x5f1   :  { %v1493_v21 = vmul.f32 %v1875_v32, %v1484_v39 }
 0x5f3   :  { %v1495_v16 = vrot.slane %v1493_v21, 4 }
 0x5f5   :  { %1513 = vmatmul.f32.vlgmr.msra.gmra.mxu1 %v1495_v16  ;;  %1533 = vmatmul.f32.vlgmr.msra.gmra.mxu2 %v1495_v16 }
 0x5f6   :  { %1553 = vmatmul.f32.vlgmr.msra.gmra.mxu3 %v1495_v16  ;;  %1573 = vmatmul.f32.vlgmr.msrb.gmra.mxu0 %v1495_v16 }
 0x672   :  { %v1514_v11 = vpop.f32.mrf.mxu1 }
 0x673   :  { %v1581_v20 = vrot.slane %v1514_v11, 2  ;;  %v1574_v35 = vpop.f32.mrf.mxu0 }
 0x674   :  { %v1584_v37 = vrot.slane %v1574_v35, 2 }
 0x675   :  { %v1589_v40 = vadd.f32 %v1581_v20, %v3305_v4  ;;  %v1664_v4 = vld [vmem:[#allocation8 + $0x28] sm:$0xff] }
 0x676   :  { %v1592_v61 = vadd.f32 %v1584_v37, %v3306_v34  ;;  %1692 = vmatpush.msrb.mxu1 %v1664_v4 }
 0x677   :  { %v1747_v25 = vmul.f32 -1.442695, %v1589_v40 }
 0x678   :  { %v1749_v49 = vmul.f32 -1.442695, %v1592_v61  ;;  %v1534_v18 = vpop.f32.mrf.mxu2  ;;  %1693 = vmatpush.msrb.mxu1 %v1663_v47 }
 0x679   :  { %1876 = vpow2.f32 %v1747_v25  ;;  %v1582_v33 = vrot.slane %v1534_v18, 2  ;;  %v1554_v48 = vpop.f32.mrf.mxu3 }
 0x67a   :  { %1878 = vpow2.f32 %v1749_v49  ;;  %1694 = vmatpush.msrb.mxu1 %v1662_v54  ;;  %v1583_v63 = vrot.slane %v1554_v48, 2 }
 0x67b   :  { %v1590_v44 = vadd.f32 %v1582_v33, %v3307_v42  ;;  %v1659_v42 = vld [vmem:[#allocation8] sm:$0xff] }
 0x67c   :  { %1695 = vmatpush.msrb.mxu1 %v1661_v55  ;;  %v1591_v3 = vadd.f32 %v1583_v63, %v3308_v52 }
 0x67d   :  { %v1748_v43 = vmul.f32 -1.442695, %v1590_v44 }
 0x67e   :  { %1696 = vmatpush.msrb.mxu1 %v1660_v53 }
 0x67f   :  { %v1877_v34 = vpop.eup %1876  ;;  %1880 = vpow2.f32 %v1748_v43 }
 0x680   :  { %v1879_v60 = vpop.eup %1878  ;;  %v1596_v46 = vadd.f32 1.0, %v1877_v34  ;;  %1697 = vmatpush.msrb.mxu1 %v1659_v42 }
 0x681   :  { %v1635_v51 = vadd.f32 1.0, %v1879_v60 }
 0x682   :  { %1882 = vrcp.f32 %v1596_v46  ;;  %v1608_v23 = vand.u32 2147483648, %v1596_v46  ;;  %vm1602_vm7 = vweird.f32 %v1596_v46  ;;  %v1606_v26 = vand.u32 2147483647, %v1596_v46 }
 0x683   :  { %1884 = vrcp.f32 %v1635_v51  ;;  %v1647_v9 = vand.u32 2147483648, %v1635_v51  ;;  %vm1641_vm15 = vweird.f32 %v1635_v51  ;;  %v1645_v11 = vand.u32 2147483647, %v1635_v51 }
 0x684   :  { %v1609_v13 = vor.u32 1.1754944e-38, %v1608_v23  ;;  %vm1607_vm11 = vcmp.eq.f32.partialorder %v1606_v26, 8.507059e+37 }
 0x685   :  { %v1881_v59 = vpop.eup %1880  ;;  %v1648_v35 = vor.u32 1.1754944e-38, %v1647_v9  ;;  %vm1646_vm1 = vcmp.eq.f32.partialorder %v1645_v11, 8.507059e+37 }
 0x686   :  { %v1615_v58 = vadd.f32 1.0, %v1881_v59 }
 0x688   :  { %v1883_v38 = vpop.eup %1882  ;;  %1886 = vrcp.f32 %v1615_v58  ;;  %v1627_v27 = vand.u32 2147483648, %v1615_v58  ;;  %v1625_v30 = vand.u32 2147483647, %v1615_v58  ;;  %vm1621_vm10 = vweird.f32 %v1615_v58 }
 0x689   :  { %v1598_v56 = vmul.f32 %v1883_v38, %v1596_v46  ;;  %v1885_v0 = vpop.eup %1884  ;;  %vm1603_vm6 = vweird.f32 %v1883_v38  ;;  %1888 = vtanh.f32 %v1591_v3 }
 0x68a   :  { %v1637_v2 = vmul.f32 %v1885_v0, %v1635_v51  ;;  %vm1604_vm8 = vmor %vm1602_vm7, %vm1603_vm6  ;;  %v1628_v12 = vor.u32 1.1754944e-38, %v1627_v27  ;;  %vm1626_vm13 = vcmp.eq.f32.partialorder %v1625_v30, 8.507059e+37  ;;  %vm1642_vm14 = vweird.f32 %v1885_v0 }
 0x68b   :  { %v1599_v62 = vsub.f32 1.0, %v1598_v56  ;;  %vm1643_vm0 = vmor %vm1641_vm15, %vm1642_vm14 }
 0x68c   :  { %v1638_v14 = vsub.f32 1.0, %v1637_v2 }
 0x68d   :  { %v1600_v1 = vmul.f32 %v1883_v38, %v1599_v62 }
 0x68e   :  { %v1887_v17 = vpop.eup %1886  ;;  %v1639_v16 = vmul.f32 %v1885_v0, %v1638_v14 }
 0x68f   :  { %v1617_v22 = vmul.f32 %v1887_v17, %v1615_v58  ;;  %v1601_v8 = vadd.f32 %v1883_v38, %v1600_v1  ;;  %vm1622_vm9 = vweird.f32 %v1887_v17  ;;  %v1889_v39 = vpop.eup %1888 }
 0x690   :  { %vm1623_vm12 = vmor %vm1621_vm10, %vm1622_vm9  ;;  %v1640_v6 = vadd.f32 %v1885_v0, %v1639_v16 }
 0x691   :  { %v1618_v24 = vsub.f32 1.0, %v1617_v22  ;;  %v1605_v29 = vsel %vm1604_vm8, %v1883_v38, %v1601_v8 }
 0x692   :  { %v1610_v19 = vsel %vm1607_vm11, %v1609_v13, %v1605_v29  ;;  %v1644_v20 = vsel %vm1643_vm0, %v1885_v0, %v1640_v6 }
 0x693   :  { %v1619_v28 = vmul.f32 %v1887_v17, %v1618_v24  ;;  %v1655_v10 = vmul.f32 %v1889_v39, %v1610_v19  ;;  %v1649_v31 = vsel %vm1646_vm1, %v1648_v35, %v1644_v20 }
 0x695   :  { %v1620_v52 = vadd.f32 %v1887_v17, %v1619_v28 }
 0x697   :  { %v1624_v32 = vsel %vm1623_vm12, %v1887_v17, %v1620_v52 }
 0x698   :  { %v1629_v21 = vsel %vm1626_vm13, %v1628_v12, %v1624_v32 }
 0x699   :  { %v1654_v5 = vmul.f32 %v1652_v7, %v1629_v21 }
 0x69b   :  { %v1656_v15 = vadd.f32 %v1655_v10, %v1654_v5 }
 0x69d   :  { %1890 = vtanh.f32 %v1656_v15 }
 0x6a3   :  { %v1891_v36 = vpop.eup %1890 }
 0x6a4   :  { %v1658_v37 = vmul.f32 %v1891_v36, %v1649_v31 }
 0x6a6   :  { %v1680_v40 = vrot.slane %v1658_v37, 6 }
 0x6a8   :  { %1698 = vmatmul.f32.vlgmr.msrb.gmra.mxu1 %v1680_v40 }
 0x725   :  { %v1699_v61 = vpop.f32.mrf.mxu1 }
 0x726   :  { %v1700_v25 = vadd.f32 %v1763_v41, %v1699_v61 }
 0x728   :  { %1702 = vst [vmem:[#allocation10] sm:$0x3] %v1700_v25 }
 0x729   :  { %1713 = dma.vmem_to_hbm [thread:$0]  %s1709_s28, 32, %s1711_s8, [#allocation4]  }
 0x72a   :  { %2082 = dma.done.wait [#allocation4], 32  }
 0x72b   :  { %2083 = vsyncadd [#allocation4], 4294967264 }
 0x72c   :  { %1718 = vsyncpa [#allocation3], 1 }
 0x72d   :  { %1719 = vsyncpa [#allocation6], 1 }
 0x72e   :  { %1720 = vsyncpa [#allocation9], 1 }
 0x72f   :  { %1721 = vsyncpa [#allocation4], 1 }

</bundles_post_ra>
